<compile_context>
chip_gen: v7x
topology: tpu7x:2x2x1
jax: 0.10.0
libtpu: 0.0.40
codegen_flags: <defaults>
</compile_context>

<pallas_src>
import functools

import jax
import jax.numpy as jnp
from jax.experimental import pallas as pl
from jax.experimental.pallas import tpu as pltpu


def _round_up(v, m):
    return (v + m - 1) // m * m


def _graph_block_kernel(a_ref, xk_ref, xi_ref, wl_ref, wr_ref, b_ref,
                        invdeg_ref, o_ref, acc_ref, *, residual, neg_slope):
    k = pl.program_id(1)

    @pl.when(k == 0)
    def _init():
        acc_ref[...] = jnp.zeros_like(acc_ref)

    # Partial sum-aggregation for this contraction tile.
    # A is bf16 (exact small-integer edge counts); X stays f32; accumulate f32.
    acc_ref[...] += jnp.dot(a_ref[...], xk_ref[...],
                            preferred_element_type=jnp.float32)

    @pl.when(k == pl.num_programs(1) - 1)
    def _finalize():
        agg = acc_ref[...] * invdeg_ref[...]          # mean over in-neighbors
        x_blk = xi_ref[...]                           # [TM, Fin_p] root rows

        # SAGE linear with eval-mode BatchNorm folded into W / b (no concat:
        # two dots summed — identical MXU flops, no [TM, 2*Fin_p] VMEM temp).
        h = (jnp.dot(agg, wl_ref[...], preferred_element_type=jnp.float32)
             + jnp.dot(x_blk, wr_ref[...], preferred_element_type=jnp.float32)
             + b_ref[...])

        # Dropout = identity (eval).  LeakyReLU (+ residual).
        out = jnp.where(h >= 0, h, neg_slope * h)
        if residual:
            out = out + x_blk                         # requires Fin == Fout
        o_ref[...] = out.astype(o_ref.dtype)


def graph_block_forward(x, edge_index, params, *, residual_block,
                        eps=1e-5, neg_slope=0.01, tm=256, tk=512):
    """x: [N, Fin] float32, edge_index: [2, E] int32 (row0 = src, row1 = dst)."""
    n, fin = x.shape
    fout = params["w_l"].shape[0]
    if residual_block and fin != fout:
        raise ValueError("residual_block=True requires input_dim == output_dim")

    LANE = 128
    fin_p = _round_up(fin, LANE)
    fout_p = _round_up(fout, LANE)

    # Row tile and contraction tile (contraction tile must divide n_p and be a
    # multiple of 128, or be the full extent).
    tm = max(8, min(_round_up(tm, 8), _round_up(n, 8)))
    n_p = _round_up(n, tm)
    tk = min(tk, n_p)
    tk = _round_up(tk, LANE)
    if tk >= n_p or n_p % tk != 0:
        tk = n_p

    # ---- glue (plain JAX, one-time per call) --------------------------------
    # unnormalized in-adjacency counts  A[i, j] = #edges (j -> i), zero-padded.
    src, dst = edge_index[0], edge_index[1]
    counts = jnp.zeros((n_p, n_p), jnp.float32).at[dst, src].add(1.0)
    inv_deg = 1.0 / jnp.maximum(counts.sum(axis=1, keepdims=True), 1.0)  # [Np,1]
    adj = counts.astype(jnp.bfloat16)   # exact for counts < 256

    # fold eval-mode BatchNorm into the SAGE linear weights / bias
    s = params["gamma"] * jax.lax.rsqrt(params["running_var"] + eps)     # [Fout]
    wl = params["w_l"].T * s                                             # [Fin, Fout]
    wr = params["w_r"].T * s
    b = (params["b_l"] - params["running_mean"]) * s + params["beta"]    # [Fout]

    wl_p = jnp.zeros((fin_p, fout_p), jnp.float32).at[:fin, :fout].set(wl)
    wr_p = jnp.zeros((fin_p, fout_p), jnp.float32).at[:fin, :fout].set(wr)
    b_row = jnp.zeros((1, fout_p), jnp.float32).at[0, :fout].set(b)
    x_p = jnp.zeros((n_p, fin_p), jnp.float32).at[:n, :fin].set(x)

    kernel = functools.partial(_graph_block_kernel, residual=residual_block,
                               neg_slope=neg_slope)

    grid = (n_p // tm, n_p // tk)

    flops = int(2 * n_p * n_p * fin_p + 4 * n_p * fin_p * fout_p)
    bytes_accessed = int(n_p * n_p * 2                      # bf16 adjacency
                         + 2 * n_p * fin_p * 4               # x (two views)
                         + 2 * fin_p * fout_p * 4            # wl, wr
                         + fout_p * 4 + n_p * 4              # bias, 1/deg
                         + n_p * fout_p * 4)                 # output

    # per-step double-buffered tiles + resident weights + accumulator, with headroom
    vmem_bytes = (2 * (tm * tk * 2 + tk * fin_p * 4 + tm * fin_p * 4 + tm * fout_p * 4
                       + 2 * fin_p * fout_p * 4 + fout_p * 4 + tm * 4)
                  + tm * fin_p * 4)
    vmem_limit = int(min(100 * 1024 * 1024, max(32 * 1024 * 1024, 2 * vmem_bytes)))

    out = pl.pallas_call(
        kernel,
        out_shape=jax.ShapeDtypeStruct((n_p, fout_p), jnp.float32),
        grid=grid,
        in_specs=[
            pl.BlockSpec((tm, tk), lambda i, k: (i, k)),            # A tile (bf16)
            pl.BlockSpec((tk, fin_p), lambda i, k: (k, 0)),         # X contraction tile
            pl.BlockSpec((tm, fin_p), lambda i, k: (i, 0)),         # X root-row tile
            pl.BlockSpec((fin_p, fout_p), lambda i, k: (0, 0)),     # folded W_l
            pl.BlockSpec((fin_p, fout_p), lambda i, k: (0, 0)),     # folded W_r
            pl.BlockSpec((1, fout_p), lambda i, k: (0, 0)),         # folded bias
            pl.BlockSpec((tm, 1), lambda i, k: (i, 0)),             # 1/deg column
        ],
        out_specs=pl.BlockSpec((tm, fout_p), lambda i, k: (i, 0)),
        scratch_shapes=[pltpu.VMEM((tm, fin_p), jnp.float32)],      # A@X accumulator
        compiler_params=pltpu.CompilerParams(
            dimension_semantics=("parallel", "arbitrary"),
            vmem_limit_bytes=vmem_limit),
        cost_estimate=pl.CostEstimate(flops=flops, transcendentals=0,
                                      bytes_accessed=bytes_accessed),
    )(adj, x_p, x_p, wl_p, wr_p, b_row, inv_deg)

    return out[:n, :fout]


def init_params(key, input_dim, output_dim):
    k1, k2, k3 = jax.random.split(key, 3)
    scale = 1.0 / jnp.sqrt(input_dim)
    return {
        # SAGEConv: lin_l (with bias) on aggregated neighbors, lin_r (no bias)
        # on the root node features.
        "w_l": jax.random.uniform(k1, (output_dim, input_dim), jnp.float32, -scale, scale),
        "b_l": jax.random.uniform(k3, (output_dim,), jnp.float32, -scale, scale),
        "w_r": jax.random.uniform(k2, (output_dim, input_dim), jnp.float32, -scale, scale),
        # BatchNorm1d defaults
        "gamma": jnp.ones((output_dim,), jnp.float32),
        "beta": jnp.zeros((output_dim,), jnp.float32),
        "running_mean": jnp.zeros((output_dim,), jnp.float32),
        "running_var": jnp.ones((output_dim,), jnp.float32),
    }


def _reference(x, edge_index, params, residual_block, eps=1e-5, neg_slope=0.01):
    n = x.shape[0]
    hp = jax.lax.Precision.HIGHEST
    src, dst = edge_index[0], edge_index[1]
    adj = jnp.zeros((n, n), jnp.float32).at[dst, src].add(1.0)
    deg = jnp.maximum(adj.sum(axis=1, keepdims=True), 1.0)
    agg = jnp.dot(adj, x, precision=hp) / deg
    h = (jnp.dot(agg, params["w_l"].T, precision=hp) + params["b_l"]
         + jnp.dot(x, params["w_r"].T, precision=hp))
    bn = (h - params["running_mean"]) * jax.lax.rsqrt(params["running_var"] + eps)
    bn = bn * params["gamma"] + params["beta"]
    out = jnp.where(bn >= 0, bn, neg_slope * bn)
    if residual_block:
        out = out + x
    return out


if __name__ == "__main__":
    key = jax.random.PRNGKey(0)
    k_x, k_e, k_p = jax.random.split(key, 3)

    # nodes / features / edges (Fin == Fout so the residual branch is exercised;
    # N and F deliberately not multiples of the tiles to exercise padding).
    N, F, E = 1000, 64, 4000

    x = jax.random.normal(k_x, (N, F), jnp.float32)
    edge_index = jax.random.randint(k_e, (2, E), 0, N, jnp.int32)
    params = init_params(k_p, F, F)

    out = graph_block_forward(x, edge_index, params, residual_block=True)
    out = jax.block_until_ready(out)

    ref = _reference(x, edge_index, params, residual_block=True)
    assert out.shape == (N, F)
    max_err = float(jnp.max(jnp.abs(out - ref)))
    assert jnp.allclose(out, ref, atol=1e-3, rtol=1e-3), (
        f"mismatch vs reference (max abs err {max_err})")

    print("KERNEL_OK")
</pallas_src>

<mosaic_0001>
module attributes {stable_mosaic.version = 11 : i64} {
  func.func @_graph_block_kernel(%arg0: i32, %arg1: i32, %arg2: memref<256x512xbf16, #tpu.memory_space<vmem>>, %arg3: memref<512x128xf32, #tpu.memory_space<vmem>>, %arg4: memref<256x128xf32, #tpu.memory_space<vmem>>, %arg5: memref<128x128xf32, #tpu.memory_space<vmem>>, %arg6: memref<128x128xf32, #tpu.memory_space<vmem>>, %arg7: memref<1x128xf32, #tpu.memory_space<vmem>>, %arg8: memref<256x1xf32, #tpu.memory_space<vmem>>, %arg9: memref<256x128xf32, #tpu.memory_space<vmem>>, %arg10: memref<256x128xf32, #tpu.memory_space<vmem>>) attributes {dimension_semantics = [#tpu.dimension_semantics<parallel>, #tpu.dimension_semantics<arbitrary>], iteration_bounds = array<i64: 4, 2>, scalar_prefetch = 0 : i64, scratch_operands = 1 : i64, tpu.core_type = #tpu.core_type<tc>, window_params = [{transform_indices = @transform_0, window_bounds = array<i64: 256, 512>}, {transform_indices = @transform_1, window_bounds = array<i64: 512, 128>}, {transform_indices = @transform_2, window_bounds = array<i64: 256, 128>}, {pipeline_mode = #tpu.pipeline_mode<synchronous>, transform_indices = @transform_3, window_bounds = array<i64: 128, 128>}, {pipeline_mode = #tpu.pipeline_mode<synchronous>, transform_indices = @transform_4, window_bounds = array<i64: 128, 128>}, {pipeline_mode = #tpu.pipeline_mode<synchronous>, transform_indices = @transform_5, window_bounds = array<i64: 1, 128>}, {transform_indices = @transform_6, window_bounds = array<i64: 256, 1>}, {transform_indices = @transform_7, window_bounds = array<i64: 256, 128>}]} {
    %c0_i32 = arith.constant 0 : i32
    %0 = arith.cmpi eq, %arg1, %c0_i32 : i32
    %1 = arith.extui %0 : i1 to i32
    %c0_i32_0 = arith.constant 0 : i32
    %2 = arith.cmpi ne, %1, %c0_i32_0 : i32
    scf.if %2 {
      %cst_9 = arith.constant 0.000000e+00 : f32
      %12 = vector.broadcast %cst_9 : f32 to vector<256x128xf32>
      %c0_10 = arith.constant 0 : index
      %c0_11 = arith.constant 0 : index
      %13 = vector.load %arg10[%c0_10, %c0_11] : memref<256x128xf32, #tpu.memory_space<vmem>>, vector<256x128xf32>
      tpu.vector_store %arg10[%c0_10, %c0_11], %12 {strides = array<i32>} : memref<256x128xf32, #tpu.memory_space<vmem>>, vector<256x128xf32>,
    } else {
    }
    %c0 = arith.constant 0 : index
    %c0_1 = arith.constant 0 : index
    %3 = vector.load %arg10[%c0, %c0_1] : memref<256x128xf32, #tpu.memory_space<vmem>>, vector<256x128xf32>
    %c0_2 = arith.constant 0 : index
    %c0_3 = arith.constant 0 : index
    %4 = vector.load %arg2[%c0_2, %c0_3] : memref<256x512xbf16, #tpu.memory_space<vmem>>, vector<256x512xbf16>
    %c0_4 = arith.constant 0 : index
    %c0_5 = arith.constant 0 : index
    %5 = vector.load %arg3[%c0_4, %c0_5] : memref<512x128xf32, #tpu.memory_space<vmem>>, vector<512x128xf32>
    %cst = arith.constant dense<0.000000e+00> : vector<256x128xf32>
    %6 = tpu.matmul %4, %5, %cst {dimension_numbers = #tpu.dot_dimension_numbers<[1], [0], [0], [1], [0, 0, 1, 1], [], []>} : vector<256x512xbf16>, vector<512x128xf32>, vector<256x128xf32> -> vector<256x128xf32>
    %7 = arith.addf %3, %6 : vector<256x128xf32>
    %c0_6 = arith.constant 0 : index
    %c0_7 = arith.constant 0 : index
    %8 = vector.load %arg10[%c0_6, %c0_7] : memref<256x128xf32, #tpu.memory_space<vmem>>, vector<256x128xf32>
    tpu.vector_store %arg10[%c0_6, %c0_7], %7 {strides = array<i32>} : memref<256x128xf32, #tpu.memory_space<vmem>>, vector<256x128xf32>,
    %c1_i32 = arith.constant 1 : i32
    %9 = arith.cmpi eq, %arg1, %c1_i32 : i32
    %10 = arith.extui %9 : i1 to i32
    %c0_i32_8 = arith.constant 0 : i32
    %11 = arith.cmpi ne, %10, %c0_i32_8 : i32
    scf.if %11 {
      %c0_9 = arith.constant 0 : index
      %c0_10 = arith.constant 0 : index
      %12 = vector.load %arg10[%c0_9, %c0_10] : memref<256x128xf32, #tpu.memory_space<vmem>>, vector<256x128xf32>
      %c0_11 = arith.constant 0 : index
      %c0_12 = arith.constant 0 : index
      %13 = vector.load %arg8[%c0_11, %c0_12] : memref<256x1xf32, #tpu.memory_space<vmem>>, vector<256x1xf32>
      %14 = vector.broadcast %13 : vector<256x1xf32> to vector<256x128xf32>
      %15 = arith.mulf %12, %14 : vector<256x128xf32>
      %c0_13 = arith.constant 0 : index
      %c0_14 = arith.constant 0 : index
      %16 = vector.load %arg4[%c0_13, %c0_14] : memref<256x128xf32, #tpu.memory_space<vmem>>, vector<256x128xf32>
      %c0_15 = arith.constant 0 : index
      %c0_16 = arith.constant 0 : index
      %17 = vector.load %arg5[%c0_15, %c0_16] : memref<128x128xf32, #tpu.memory_space<vmem>>, vector<128x128xf32>
      %cst_17 = arith.constant dense<0.000000e+00> : vector<256x128xf32>
      %18 = tpu.matmul %15, %17, %cst_17 {dimension_numbers = #tpu.dot_dimension_numbers<[1], [0], [0], [1], [0, 0, 1, 1], [], []>} : vector<256x128xf32>, vector<128x128xf32>, vector<256x128xf32> -> vector<256x128xf32>
      %c0_18 = arith.constant 0 : index
      %c0_19 = arith.constant 0 : index
      %19 = vector.load %arg6[%c0_18, %c0_19] : memref<128x128xf32, #tpu.memory_space<vmem>>, vector<128x128xf32>
      %cst_20 = arith.constant dense<0.000000e+00> : vector<256x128xf32>
      %20 = tpu.matmul %16, %19, %cst_20 {dimension_numbers = #tpu.dot_dimension_numbers<[1], [0], [0], [1], [0, 0, 1, 1], [], []>} : vector<256x128xf32>, vector<128x128xf32>, vector<256x128xf32> -> vector<256x128xf32>
      %21 = arith.addf %18, %20 : vector<256x128xf32>
      %c0_21 = arith.constant 0 : index
      %c0_22 = arith.constant 0 : index
      %22 = vector.load %arg7[%c0_21, %c0_22] : memref<1x128xf32, #tpu.memory_space<vmem>>, vector<1x128xf32>
      %23 = vector.broadcast %22 : vector<1x128xf32> to vector<256x128xf32>
      %24 = arith.addf %21, %23 : vector<256x128xf32>
      %cst_23 = arith.constant 0.000000e+00 : f32
      %25 = vector.broadcast %cst_23 : f32 to vector<256x128xf32>
      %26 = arith.cmpf oge, %24, %25 : vector<256x128xf32>
      %cst_24 = arith.constant 0.00999999977 : f32
      %27 = vector.broadcast %cst_24 : f32 to vector<256x128xf32>
      %28 = arith.mulf %27, %24 : vector<256x128xf32>
      %29 = arith.select %26, %24, %28 : vector<256x128xi1>, vector<256x128xf32>
      %30 = arith.addf %29, %16 : vector<256x128xf32>
      %c0_25 = arith.constant 0 : index
      %c0_26 = arith.constant 0 : index
      %31 = vector.load %arg9[%c0_25, %c0_26] : memref<256x128xf32, #tpu.memory_space<vmem>>, vector<256x128xf32>
      tpu.vector_store %arg9[%c0_25, %c0_26], %30 {strides = array<i32>} : memref<256x128xf32, #tpu.memory_space<vmem>>, vector<256x128xf32>,
    } else {
    }
    return
  }
  func.func @transform_0(%arg0: i32, %arg1: i32) -> (i32, i32) {
    %c0_i32 = arith.constant 0 : i32
    return %arg0, %arg1 : i32, i32
  }
  func.func @transform_1(%arg0: i32, %arg1: i32) -> (i32, i32) {
    %c0_i32 = arith.constant 0 : i32
    %c0_i32_0 = arith.constant 0 : i32
    return %arg1, %c0_i32 : i32, i32
  }
  func.func @transform_2(%arg0: i32, %arg1: i32) -> (i32, i32) {
    %c0_i32 = arith.constant 0 : i32
    %c0_i32_0 = arith.constant 0 : i32
    return %arg0, %c0_i32 : i32, i32
  }
  func.func @transform_3(%arg0: i32, %arg1: i32) -> (i32, i32) {
    %c0_i32 = arith.constant 0 : i32
    %c0_i32_0 = arith.constant 0 : i32
    %c0_i32_1 = arith.constant 0 : i32
    return %c0_i32, %c0_i32_0 : i32, i32
  }
  func.func @transform_4(%arg0: i32, %arg1: i32) -> (i32, i32) {
    %c0_i32 = arith.constant 0 : i32
    %c0_i32_0 = arith.constant 0 : i32
    %c0_i32_1 = arith.constant 0 : i32
    return %c0_i32, %c0_i32_0 : i32, i32
  }
  func.func @transform_5(%arg0: i32, %arg1: i32) -> (i32, i32) {
    %c0_i32 = arith.constant 0 : i32
    %c0_i32_0 = arith.constant 0 : i32
    %c0_i32_1 = arith.constant 0 : i32
    return %c0_i32, %c0_i32_0 : i32, i32
  }
  func.func @transform_6(%arg0: i32, %arg1: i32) -> (i32, i32) {
    %c0_i32 = arith.constant 0 : i32
    %c0_i32_0 = arith.constant 0 : i32
    return %arg0, %c0_i32 : i32, i32
  }
  func.func @transform_7(%arg0: i32, %arg1: i32) -> (i32, i32) {
    %c0_i32 = arith.constant 0 : i32
    %c0_i32_0 = arith.constant 0 : i32
    return %arg0, %c0_i32 : i32, i32
  }
}

</mosaic_0001>

<bundles_post_ra>
// kernel: tpu_custom_call.1
= control target key start
LH: loop header
LB: loop body
LE: loop exit
PB: predicated region body
PF: predicated region fallthrough
CT: control target
= control target key end

     0   :  { %s5018_s0 = inlined_call_operand.hbm [shape: bf16[1024,1024], index: 0, kind: input, shape index: {}]   ;;  %s5019_s1 = inlined_call_operand.hbm [shape: f32[1024,128], index: 1, kind: input, shape index: {}]   ;;  %s5020_s2 = inlined_call_operand.hbm [shape: f32[1024,128], index: 2, kind: input, shape index: {}]   ;;  %s5021_s3 = inlined_call_operand.hbm [shape: f32[128,128], index: 3, kind: input, shape index: {}]   ;;  %s5022_s4 = inlined_call_operand.hbm [shape: f32[128,128], index: 4, kind: input, shape index: {}]   ;;  %s5023_s5 = inlined_call_operand.hbm [shape: f32[1,128], index: 5, kind: input, shape index: {}]   ;;  %s5024_s6 = inlined_call_operand.vmem [shape: f32[1024,1], index: 6, kind: input, shape index: {}]   ;;  %s5025_s7 = inlined_call_operand.hbm [shape: f32[1024,128], index: 7, kind: output, shape index: {}]  }
   0x1   :  { %5058 = sst [smem:[#allocation46_spill]] %s5018_s0 }
   0x2   :  { %5059 = sst [smem:[#allocation47_spill]] %s5019_s1 }
   0x3   :  { %5060 = sst [smem:[#allocation48_spill]] %s5020_s2 }
   0x4   :  { %5061 = sst [smem:[#allocation49_spill]] %s5021_s3 }
   0x5   :  { %5062 = sst [smem:[#allocation50_spill]] %s5024_s6 }
   0x6   :  { %5063 = sst [smem:[#allocation51_spill]] %s5025_s7 }
   0x7   :  { %12 = vsyncpa [#allocation4], 0 }
   0x8   :  { %14 = vsyncpa [#allocation4 + $0x1], 0 }
   0x9   :  { %15 = vsyncpa [#allocation7], 0 }
   0xa   :  { %17 = vsyncpa [#allocation7 + $0x1], 0 }
   0xb   :  { %18 = vsyncpa [#allocation10], 0 }
   0xc   :  { %19 = vsyncpa [#allocation13], 0 }
   0xd   :  { %20 = vsyncpa [#allocation5], 0 }
   0xe   :  { %22 = vsyncpa [#allocation5 + $0x1], 0  ;;  %s4028_s24 = smov 0   ;;  %s4030_s25 = smov 0  }
   0xf   :  { %s4032_s26 = smov 0   ;;  %s4034_s27 = smov 0  }
  0x10   :  { %s4036_s28 = smov 0   ;;  %s4038_s29 = smov 0  }
  0x11   :  { %s4040_s30 = smov 0   ;;  %s4042_s8 = smov 0  }
  0x12   :  { %s4044_s9 = smov 0   ;;  %s4046_s10 = smov 0  }
  0x13   :  { %s4048_s11 = smov 0   ;;  %s4050_s12 = smov 0  }
  0x14   :  { %s4052_s13 = smov 0   ;;  %s4054_s14 = smov 0  }
  0x15 LB: > { %5064 = sst [smem:[#allocation21_spill]] %s3934_s28  ;;  %s4099_s15 = sadd.s32 4294967295, %s3970_s14   ;;  %s3970_s14 = sphi %s4054_s14, %s28_s14   ;;  %s3966_s13 = sphi %s4052_s13, %s5172_s13   ;;  %s3962_s12 = sphi %s4050_s12, %s5171_s12   ;;  %s3958_s11 = sphi %s4048_s11, %s5170_s11   ;;  %s3954_s10 = sphi %s4046_s10, %s5169_s10   ;;  %s3950_s9 = sphi %s4044_s9, %s5168_s9   ;;  %s3946_s8 = sphi %s4042_s8, %s5167_s8   ;;  %s3942_s30 = sphi %s4040_s30, %s5166_s30   ;;  %s3938_s29 = sphi %s4038_s29, %s5165_s29   ;;  %s3934_s28 = sphi %s4036_s28, %s5157_s28   ;;  %s3930_s27 = sphi %s4034_s27, %s5164_s27   ;;  %s3926_s26 = sphi %s4032_s26, %s5163_s26   ;;  %s3922_s25 = sphi %s4030_s25, %s5162_s25   ;;  %s3918_s24 = sphi %s4028_s24, %s5161_s24  }
  0x16   : > { %5065 = sst [smem:[#allocation22_spill]] %s3938_s29  ;;  %p2586_p0 = scmp.ge.s32.totalorder %s3970_s14, 1 }
  0x17   : > { %5066 = sst [smem:[#allocation23_spill]] %s3954_s10  ;;  %p5027_p1 = scmp.eq.s32.totalorder %s4099_s15, 0 }
  0x18   : > { %5067 = sst [smem:[#allocation24_spill]] %s3958_s11  ;;  %p240_p3 = scmp.lt.s32.totalorder %s3970_s14, 9 }
  0x19   : > { %s3972_s17 = smov [#allocation9]   ;;  %s5071_s3 = sld [smem:[#allocation49_spill]] }
  0x1a   : > { %p4105_p4 = pnand %p2586_p0, %p240_p3  ;;  %s252_s18 = sshll.u32 %s3972_s17, 4  ;;  %s253_s18 = int_to_ptr.vmem [resolvable:$true] %s252_s18 }
  0x1c   : > { %s5068_s16 = scalar_select %p4105_p4, 1, 0 }
  0x1d   : > { %p3380_p5 = pneg %p4105_p4 }
  0x1e   : > { %5069 = sst [smem:[#allocation25_spill]] %s5068_s16 }
  0x1f   : > { %p4113_p6 = pnand %p3380_p5, %p5027_p1  ;;  %s3634_s22 = scalar_lea.hbm %s5071_s3, 2048 }
  0x20   : > { %p3635_p7 = scmp.ne.s32.totalorder %s5071_s3, %s3634_s22  ;;  %p3641_p11 = scmp.lt.u32.totalorder %s3634_s22, %s5071_s3 }
  0x21   : > { %s5070_s19 = scalar_select %p4113_p6, 1, 0 }
  0x22   : > { %p4125_p8 = pneg %p4113_p6 }
  0x24   : > { %p3637_p9 = pnand %p4125_p8, %p3635_p7 }
  0x26   : > { %p3638_p10 = pneg %p3637_p9 }
  0x28   : > { %p3643_p12 = pnand %p3641_p11, %p3638_p10 }
  0x2a   : > { %3646 = shalt.err (!%p3643_p12)
}
  0x2b   : > { %s3647_s20 = scalar_lea.vmem %s253_s18, 2048  ;;  %p3655_p5 = scmp.lt.s32.totalorder %s253_s18, %s253_s18 }
  0x2c   : > { %p3648_p13 = scmp.ne.s32.totalorder %s253_s18, %s3647_s20  ;;  %p3656_p2 = scmp.lt.s32.totalorder %s3647_s20, %s3647_s20 }
  0x2e   : > { %p3650_p0 = pnand %p3648_p13, %p4125_p8  ;;  %p3657_p1 = por %p3656_p2, %p3655_p5 }
  0x30   : > { %p3651_p3 = pneg %p3650_p0 }
  0x32   : > { %p3658_p4 = pnand %p3657_p1, %p3651_p3 }
  0x34   : > { %3661 = shalt.err (!%p3658_p4)
}
  0x35   : > { %s5029_s7 = smov 128   ;;  %s5031_s6 = smov 8  }
  0x36   : > { %3383 = dma.hbm_to_vmem [thread:$0]  (!%p4113_p6), %s5071_s3, 2048, %s253_s18, [#allocation10], %s5029_s7, %s5029_s7, %s5031_s6  }
  0x37   : > { %s37_s22 = sadd.s32 1, %s3962_s12  ;;  %s40_s23 = sadd.s32 1, %s3966_s13 }
  0x38   : > { %p38_p1 = scmp.ge.s32.totalorder %s37_s22, 2  ;;  %p5042_p2 = scmp.eq.s32.totalorder %s3970_s14, 0 }
  0x39   : > { %s75_s20 = sadd.s32 1, %s3938_s29  ;;  %p82_p4 = scmp.ne.s32.totalorder %s3938_s29, %s3934_s28 }
  0x3a   : > { %s5174_s22 = smov (%p38_p1, %s37_s22), 0  ;;  %s5176_s23 = smov (!%p38_p1, %s40_s23), %s3966_s13 }
  0x3b   : > { %5073 = sst [smem:[#allocation26_spill]] %s5174_s22  ;;  %s45_s11 = ssub.s32 %s3962_s12, %s5174_s22 }
  0x3c   : > { %p4157_p7 = por %p82_p4, %p5042_p2  ;;  %p42_p9 = scmp.ge.s32.totalorder %s5176_s23, 4 }
  0x3d   : > { %p73_p10 = scmp.eq.s32.totalorder %s45_s11, 0  ;;  %p88_p11 = scmp.ne.s32.totalorder %s3934_s28, %s3930_s27 }
  0x3e   : > { %p5041_p12 = scmp.lt.s32.totalorder %s3970_s14, 8  ;;  %s5178_s23 = smov (%p42_p9, %s5176_s23), 0 }
  0x3f   : > { %5075 = sst [smem:[#allocation27_spill]] %s5178_s23  ;;  %s4171_s21 = ssub.s32 %s3966_s13, %s5178_s23 }
  0x40   : > { %s4167_s10 = scalar_select %p73_p10, %s3938_s29, %s75_s20  }
  0x41   : > { %p5077_p13 = scmp.eq.s32.totalorder %s4099_s15, 0  ;;  %s46_s6 = sor.u32 %s45_s11, %s4171_s21 }
  0x42   : > { %5076 = sst [smem:[#allocation28_spill]] %s4167_s10  ;;  %p4181_p5 = scmp.eq.s32.totalorder %s46_s6, 0 }
  0x43   : > { %p4175_p0 = por %p88_p11, %p5077_p13  ;;  %s314_s3 = sand.u32 1, %s3970_s14  }
  0x44   : > { %s5080_s27 = scalar_select %p4181_p5, 1, 0 }
  0x45   : > { %s5078_s7 = scalar_select %p4175_p0, 1, 0 }
  0x46   : > { %s316_s22 = sand.u32 1, %s3938_s29   ;;  %s2685_s20 = sshll.u32 %s3962_s12, 13 }
  0x47   : > { %5079 = sst [smem:[#allocation29_spill]] %s5078_s7  ;;  %s2596_s28 = sshll.u32 %s316_s22, 9 }
  0x48   : > { %s5081_s1 = sld [smem:[#allocation47_spill]]  ;;  %s318_s2 = scalar_lea.vmem [#allocation6], %s2596_s28 }
  0x49   : > { %s325_s11 = sshll.u32 %s318_s2, 4  ;;  %p4197_p1 = pnand %p5041_p12, %p4157_p7  ;;  %s4201_s11 = int_to_ptr.vmem [resolvable:$true] %s325_s11 }
  0x4a   : > { %s3975_s22 = smov [#allocation11]   ;;  %s4205_s10 = scalar_lea.sflag [#allocation7], %s314_s3 }
  0x4b   : > { %s4203_s23 = sshll.u32 %s3975_s22, 4  ;;  %5083 = sst [smem:[#allocation30_spill]] %s4205_s10  ;;  %s266_s23 = int_to_ptr.vmem [resolvable:$true] %s4203_s23 }
  0x4c   : > { %p3664_p9 = pneg %p4197_p1 }
  0x4e   : > { %s4191_s16 = scalar_lea.hbm %s5081_s1, %s2685_s20  ;;  %s3667_s18 = scalar_lea.hbm %s5081_s1, 16384 }
  0x4f   : > { %s3662_s20 = scalar_lea.hbm %s4191_s16, 8192  ;;  %p3668_p11 = scmp.lt.u32.totalorder %s4191_s16, %s5081_s1 }
  0x50   : > { %p3663_p4 = scmp.ne.s32.totalorder %s4191_s16, %s3662_s20  ;;  %p3669_p13 = scmp.lt.u32.totalorder %s3667_s18, %s3662_s20 }
  0x51   : > { %p3671_p12 = scmp.lt.u32.totalorder %s3662_s20, %s4191_s16 }
  0x52   : > { %p3665_p10 = pnand %p3664_p9, %p3663_p4  ;;  %p3670_p3 = por %p3669_p13, %p3668_p11 }
  0x54   : > { %p3666_p7 = pneg %p3665_p10  ;;  %p3672_p2 = por %p3671_p12, %p3670_p3 }
  0x56   : > { %p3673_p0 = pnand %p3672_p2, %p3666_p7 }
  0x58   : > { %3676 = shalt.err (!%p3673_p0)
}
  0x59   : > { %s3677_s3 = scalar_lea.vmem %s4201_s11, 8192  ;;  %s3976_s22 = smov [#allocation6]  }
  0x5a   : > { %p3678_p4 = scmp.ne.s32.totalorder %s4201_s11, %s3677_s3  ;;  %s3682_s2 = sshll.u32 %s3976_s22, 4  ;;  %s3683_s2 = int_to_ptr.vmem [resolvable:$false] %s3682_s2 }
  0x5b   : > { %s3684_s29 = scalar_lea.vmem %s3683_s2, 16384  ;;  %p3685_p6 = scmp.lt.s32.totalorder %s4201_s11, %s3683_s2 }
  0x5c   : > { %p3680_p10 = pnand %p3678_p4, %p3664_p9  ;;  %p3686_p11 = scmp.lt.s32.totalorder %s3684_s29, %s3677_s3 }
  0x5e   : > { %p3681_p5 = pneg %p3680_p10  ;;  %p3687_p13 = por %p3686_p11, %p3685_p6 }
  0x60   : > { %p3688_p12 = pnand %p3687_p13, %p3681_p5 }
  0x62   : > { %3691 = shalt.err (!%p3688_p12)
}
  0x63   : > { %s5084_s7 = smov 8   ;;  %s5085_s20 = smov 128  }
  0x64   : > { %3396 = dma.hbm_to_vmem [thread:$0]  (!%p4197_p1), %s4191_s16, 8192, %s4201_s11, %s4205_s10, %s5085_s20, %s5085_s20, %s5084_s7  }
  0x65   : > { %s3692_s22 = scalar_lea.hbm %s5022_s4, 2048 }
  0x66   : > { %p3693_p6 = scmp.ne.s32.totalorder %s5022_s4, %s3692_s22  ;;  %p3699_p3 = scmp.lt.u32.totalorder %s3692_s22, %s5022_s4 }
  0x68   : > { %p3695_p2 = pnand %p3693_p6, %p4125_p8 }
  0x6a   : > { %p3696_p0 = pneg %p3695_p2 }
  0x6c   : > { %p3701_p5 = pnand %p3699_p3, %p3696_p0 }
  0x6e   : > { %3704 = shalt.err (!%p3701_p5)
}
  0x6f   : > { %s3705_s1 = scalar_lea.vmem %s266_s23, 2048  ;;  %p3713_p4 = scmp.lt.s32.totalorder %s266_s23, %s266_s23 }
  0x70   : > { %p3706_p1 = scmp.ne.s32.totalorder %s266_s23, %s3705_s1  ;;  %p3714_p10 = scmp.lt.s32.totalorder %s3705_s1, %s3705_s1 }
  0x72   : > { %p3708_p9 = pnand %p3706_p1, %p4125_p8  ;;  %p3715_p11 = por %p3714_p10, %p3713_p4 }
  0x74   : > { %p3709_p7 = pneg %p3708_p9 }
  0x76   : > { %p3716_p13 = pnand %p3715_p11, %p3709_p7 }
  0x78   : > { %3719 = shalt.err (!%p3716_p13)
}
  0x79   : > { %p5086_p12 = scmp.ne.s32.totalorder %s5070_s19, 0  ;;  %s3977_s28 = smov [#allocation12]  }
  0x7a   : > { %s279_s18 = sshll.u32 %s3977_s28, 4  ;;  %s3720_s1 = scalar_lea.hbm %s5023_s5, 16  ;;  %s280_s18 = int_to_ptr.vmem [resolvable:$true] %s279_s18 }
  0x7b   : > { %3386 = dma.hbm_to_vmem [thread:$0]  (!%p5086_p12), %s5022_s4, 2048, %s266_s23, [#allocation10], %s5085_s20, %s5085_s20, %s5084_s7  }
  0x7c   : > { %p3721_p6 = scmp.ne.s32.totalorder %s5023_s5, %s3720_s1  ;;  %p3727_p3 = scmp.lt.u32.totalorder %s3720_s1, %s5023_s5 }
  0x7e   : > { %p3723_p2 = pnand %p3721_p6, %p4125_p8 }
  0x80   : > { %p3724_p0 = pneg %p3723_p2 }
  0x82   : > { %p3729_p5 = pnand %p3727_p3, %p3724_p0 }
  0x84   : > { %3732 = shalt.err (!%p3729_p5)
}
  0x85   : > { %s3733_s23 = scalar_lea.vmem %s280_s18, 16  ;;  %s3740_s16 = scalar_lea.vmem %s280_s18, 32 }
  0x86   : > { %p3734_p1 = scmp.ne.s32.totalorder %s280_s18, %s3733_s23  ;;  %p3741_p4 = scmp.lt.s32.totalorder %s280_s18, %s280_s18 }
  0x87   : > { %p3742_p10 = scmp.lt.s32.totalorder %s3740_s16, %s3733_s23 }
  0x88   : > { %p3736_p9 = pnand %p3734_p1, %p4125_p8 }
  0x89   : > { %p3743_p11 = por %p3742_p10, %p3741_p4 }
  0x8a   : > { %p3737_p7 = pneg %p3736_p9 }
  0x8c   : > { %p3744_p13 = pnand %p3743_p11, %p3737_p7 }
  0x8e   : > { %3747 = shalt.err (!%p3744_p13)
}
  0x8f   : > { %3389 = dma.hbm_to_vmem [thread:$0]  (!%p5086_p12), %s5023_s5, 16, %s280_s18, [#allocation13]  }
  0x90   : > { %s49_s17 = sadd.s32 1, %s3950_s9  ;;  %p56_p8 = scmp.ne.s32.totalorder %s3950_s9, %s3946_s8 }
  0x91   : > { %p5087_p6 = scmp.ne.s32.totalorder %s5080_s27, 0  ;;  %p5088_p2 = scmp.eq.s32.totalorder %s3970_s14, 0 }
  0x92   : > { %p62_p3 = scmp.ne.s32.totalorder %s3946_s8, %s3942_s30  ;;  %s290_s22 = sand.u32 1, %s3950_s9  }
  0x93   : > { %s4282_s19 = scalar_select %p5087_p6, %s3950_s9, %s49_s17  }
  0x94   : > { %p4286_p0 = por %p5088_p2, %p56_p8  ;;  %s2593_s3 = sshll.u32 %s3962_s12, 2 }
  0x95   : > { %p5090_p5 = scmp.eq.s32.totalorder %s4099_s15, 0  ;;  %s2591_s18 = sshll.u32 %s290_s22, 9 }
  0x96   : > { %s2684_s2 = sshll.u32 %s3966_s13, 8  ;;  %s294_s29 = scalar_lea.vmem [#allocation3], %s2591_s18 }
  0x97   : > { %p4296_p1 = por %p5090_p5, %p62_p3  ;;  %s301_s6 = sadd.s32 %s2684_s2, %s2593_s3 }
  0x98   : > { %s2595_s27 = sshll.u32 %s301_s6, 6  ;;  %s304_s23 = sshll.u32 %s294_s29, 4  ;;  %s4306_s23 = int_to_ptr.vmem [resolvable:$true] %s304_s23 }
  0x99   : > { %s5092_s0 = sld [smem:[#allocation46_spill]]  ;;  %p5093_p12 = scmp.lt.s32.totalorder %s3970_s14, 8 }
  0x9a   : > { %s4316_s17 = scalar_lea.sflag [#allocation4], %s290_s22 }
  0x9b   : > { %p4312_p9 = pnand %p5093_p12, %p4286_p0 }
  0x9d   : > { %p3750_p4 = pneg %p4312_p9 }
  0x9f   : > { %s4304_s28 = scalar_lea.hbm %s5092_s0, %s2595_s27  ;;  %s3753_s10 = scalar_lea.hbm %s5092_s0, 65536 }
  0xa0   : > { %s3748_s3 = scalar_lea.hbm %s4304_s28, 8192  ;;  %p3754_p13 = scmp.lt.u32.totalorder %s4304_s28, %s5092_s0 }
  0xa1   : > { %p3749_p7 = scmp.ne.s32.totalorder %s4304_s28, %s3748_s3  ;;  %p3755_p8 = scmp.lt.u32.totalorder %s3753_s10, %s3748_s3 }
  0xa2   : > { %p3757_p2 = scmp.lt.u32.totalorder %s3748_s3, %s4304_s28 }
  0xa3   : > { %p3751_p10 = pnand %p3750_p4, %p3749_p7  ;;  %p3756_p6 = por %p3755_p8, %p3754_p13 }
  0xa5   : > { %p3752_p11 = pneg %p3751_p10  ;;  %p3758_p0 = por %p3757_p2, %p3756_p6 }
  0xa7   : > { %p3759_p3 = pnand %p3758_p0, %p3752_p11 }
  0xa9   : > { %3762 = shalt.err (!%p3759_p3)
}
  0xaa   : > { %s3763_s22 = scalar_lea.vmem %s4306_s23, 8192  ;;  %s3978_s29 = smov [#allocation3]  }
  0xab   : > { %p3764_p5 = scmp.ne.s32.totalorder %s4306_s23, %s3763_s22  ;;  %s3768_s16 = sshll.u32 %s3978_s29, 4  ;;  %s3769_s16 = int_to_ptr.vmem [resolvable:$false] %s3768_s16 }
  0xac   : > { %s3770_s11 = scalar_lea.vmem %s3769_s16, 16384  ;;  %p3771_p10 = scmp.lt.s32.totalorder %s4306_s23, %s3769_s16 }
  0xad   : > { %p3766_p12 = pnand %p3764_p5, %p3750_p4  ;;  %p3772_p13 = scmp.lt.s32.totalorder %s3770_s11, %s3763_s22 }
  0xaf   : > { %p3767_p7 = pneg %p3766_p12  ;;  %p3773_p8 = por %p3772_p13, %p3771_p10 }
  0xb1   : > { %p3774_p6 = pnand %p3773_p8, %p3767_p7 }
  0xb3   : > { %3777 = shalt.err (!%p3774_p6)
}
  0xb4   : > { %s3979_s3 = smov 512   ;;  %s3980_s18 = smov 256  }
  0xb5   : > { %s3981_s2 = smov 16   ;;  %s2585_s10 = sadd.s32 4294967294, %s3970_s14  }
  0xb6   : > { %3393 = dma.hbm_to_vmem [thread:$0]  (!%p4312_p9), %s4304_s28, 8192, %s4306_s23, %s4316_s17, %s3979_s3, %s3980_s18, %s3981_s2  }
  0xb7   : > { %s101_s6 = sadd.s32 1, %s3926_s26  ;;  %p108_p4 = scmp.ne.s32.totalorder %s3926_s26, %s3922_s25 }
  0xb8   : > { %p5095_p11 = scmp.eq.s32.totalorder %s4171_s21, 0  ;;  %p5096_p2 = scmp.eq.s32.totalorder %s3970_s14, 0 }
  0xb9   : > { %p114_p3 = scmp.ne.s32.totalorder %s3922_s25, %s3918_s24  ;;  %p5098_p5 = scmp.eq.s32.totalorder %s4099_s15, 7 }
  0xba   : > { %s4351_s27 = scalar_select %p5095_p11, %s3926_s26, %s101_s6  }
  0xbb   : > { %p4355_p0 = por %p108_p4, %p5096_p2  ;;  %p4363_p12 = por %p5098_p5, %p108_p4 }
  0xbc   : > { %p233_p9 = scmp.eq.s32.totalorder %s2585_s10, 7  ;;  %p5100_p7 = scmp.eq.s32.totalorder %s4099_s15, 0 }
  0xbd   : > { %s5099_s29 = scalar_select %p4363_p12, 1, 0 }
  0xbe   : > { %p4369_p10 = por %p114_p3, %p5100_p7  ;;  %s337_s21 = sand.u32 1, %s3926_s26  }
  0xbf   : > { %p4374_p13 = por %p233_p9, %p114_p3  ;;  %s2599_s30 = sshll.u32 %s337_s21, 8 }
  0xc0   : > { %s5101_s23 = scalar_select %p4369_p10, 1, 0 }
  0xc1   : > { %s5102_s28 = scalar_select %p4374_p13, 1, 0 }
  0xc2   : > { %s2686_s17 = sshll.u32 %s3966_s13, 12  ;;  %s5103_s3 = sld [smem:[#allocation48_spill]] }
  0xc3   : > { %s339_s2 = scalar_lea.vmem [#allocation8], %s2599_s30  ;;  %p5104_p8 = scmp.lt.s32.totalorder %s3970_s14, 8 }
  0xc4   : > { %s346_s10 = sshll.u32 %s339_s2, 4  ;;  %s4384_s10 = int_to_ptr.vmem [resolvable:$true] %s346_s10 }
  0xc5   : > { %p4390_p6 = pnand %p5104_p8, %p4355_p0 }
  0xc7   : > { %p3780_p11 = pneg %p4390_p6 }
  0xc8   : > { %s4382_s18 = scalar_lea.hbm %s5103_s3, %s2686_s17  ;;  %s3783_s16 = scalar_lea.hbm %s5103_s3, 16384 }
  0xc9   : > { %s3778_s21 = scalar_lea.hbm %s4382_s18, 4096  ;;  %p3784_p0 = scmp.lt.u32.totalorder %s4382_s18, %s5103_s3 }
  0xca   : > { %p3779_p4 = scmp.ne.s32.totalorder %s4382_s18, %s3778_s21  ;;  %p3785_p5 = scmp.lt.u32.totalorder %s3783_s16, %s3778_s21 }
  0xcb   : > { %p3787_p7 = scmp.lt.u32.totalorder %s3778_s21, %s4382_s18 }
  0xcc   : > { %p3781_p2 = pnand %p3780_p11, %p3779_p4  ;;  %p3786_p9 = por %p3785_p5, %p3784_p0 }
  0xce   : > { %p3782_p3 = pneg %p3781_p2  ;;  %p3788_p8 = por %p3787_p7, %p3786_p9 }
  0xd0   : > { %p3789_p13 = pnand %p3788_p8, %p3782_p3 }
  0xd2   : > { %3792 = shalt.err (!%p3789_p13)
}
  0xd3   : > { %s3793_s2 = scalar_lea.vmem %s4384_s10, 4096  ;;  %s3982_s30 = smov [#allocation8]  }
  0xd4   : > { %p3794_p4 = scmp.ne.s32.totalorder %s4384_s10, %s3793_s2  ;;  %s3798_s17 = sshll.u32 %s3982_s30, 4  ;;  %s3799_s17 = int_to_ptr.vmem [resolvable:$false] %s3798_s17 }
  0xd5   : > { %s3800_s22 = scalar_lea.vmem %s3799_s17, 8192  ;;  %p3801_p10 = scmp.lt.s32.totalorder %s4384_s10, %s3799_s17 }
  0xd6   : > { %p3796_p2 = pnand %p3794_p4, %p3780_p11  ;;  %p3802_p0 = scmp.lt.s32.totalorder %s3800_s22, %s3793_s2 }
  0xd8   : > { %p3797_p12 = pneg %p3796_p2  ;;  %p3803_p5 = por %p3802_p0, %p3801_p10 }
  0xda   : > { %p3804_p9 = pnand %p3803_p5, %p3797_p12 }
  0xdc   : > { %3807 = shalt.err (!%p3804_p9)
}
  0xdd   : > { %s5106_s21 = sld [smem:[#allocation30_spill]]  ;;  %s5107_s16 = sld [smem:[#allocation25_spill]] }
  0xe3   : > { %3399 = dma.hbm_to_vmem [thread:$0]  (!%p4390_p6), %s4382_s18, 4096, %s4384_s10, %s5106_s21, %s5085_s20, %s5085_s20, %s5084_s7  }
  0xe4   : > { %p5108_p13 = scmp.ne.s32.totalorder %s5107_s16, 0 }
  0xe5   : > { %s369_s11 = sand.u32 (!%p5108_p13), 1, %s3946_s8  }
  0xe6   : > { %367 = sbr.rel (%p5108_p13) target bundleno = 1111 (0x457), region = 48  ;;  %s2603_s30 = sshll.u32 (!%p5108_p13), %s369_s11, 9 }
  0xe7   : > { %s370_s2 = scalar_lea.sflag (!%p5108_p13), [#allocation4], %s369_s11  ;;  %s4426_s17 = scalar_lea.vmem (!%p5108_p13), [#allocation3], %s2603_s30 }
  0xed   : > { %3893 = dma.done.wait (%p4296_p1), %s370_s2, 8192  }
  0xee   : > { %3895 = vsyncadd (%p4296_p1), %s370_s2, 4294959104  ;;  %s5109_s6 = sld [smem:[#allocation21_spill]]  ;;  %s378_s0 = sand.u32 1, %s4099_s15  }
  0xef   : > { %s5110_s22 = sld [smem:[#allocation29_spill]]  ;;  %s379_s18 = scalar_lea.sflag [#allocation7], %s378_s0 }
  0xf4   : > { %s380_s7 = sand.u32 1, %s5109_s6  }
  0xf5   : > { %s2604_s20 = sshll.u32 %s380_s7, 9  ;;  %p5111_p12 = scmp.ne.s32.totalorder %s5110_s22, 0 }
  0xf6   : > { %s4434_s10 = scalar_lea.vmem [#allocation6], %s2604_s20 }
  0xf7   : > { %3897 = dma.done.wait (%p5111_p12), %s379_s18, 8192  }
  0xf8   : > { %3899 = vsyncadd (%p5111_p12), %s379_s18, 4294959104  ;;  %s389_s21 = sand.u32 1, %s3922_s25   ;;  %p5112_p1 = scmp.ne.s32.totalorder %s5101_s23, 0 }
  0xf9   : > { %s2605_s1 = sshll.u32 %s389_s21, 8 }
  0xfa   : > { %s4443_s16 = scalar_lea.vmem [#allocation8], %s2605_s1 }
  0xfb   : > { %3901 = dma.done.wait (%p5112_p1), %s379_s18, 4096  }
  0xfc   : > { %3903 = vsyncadd (%p5112_p1), %s379_s18, 4294963200  ;;  %p5113_p10 = scmp.eq.s32.totalorder %s4099_s15, 0 }
  0xfe   : > { %3905 = dma.done.wait (%p5113_p10), [#allocation10], 4096   ;;  %p5114_p6 = pmov %p5113_p10 }
 0x100   : > { %3907 = vsyncadd (%p5114_p6), [#allocation10], 4294963200  ;;  %p5115_p11 = pmov %p5114_p6 }
 0x101   : > { %p5116_p3 = pmov %p5114_p6 }
 0x102   : > { %3909 = dma.done.wait (%p5115_p11), [#allocation13], 16  }
 0x103   : > { %3911 = vsyncadd (%p5116_p3), [#allocation13], 4294967280  ;;  %s5117_s0 = sld [smem:[#allocation24_spill]]  ;;  %s4463_s7 = scalar_lea.vmem [#allocation14], %s2605_s1 }
 0x104   : > { %s5118_s6 = sld [smem:[#allocation50_spill]]  ;;  %s5119_s20 = sld [smem:[#allocation23_spill]] }
 0x109   : > { %s2610_s11 = sshll.u32 %s5117_s0, 5 }
 0x10a   : > { %p454_p7 = scmp.lt.s32.totalorder %s2610_s11, 127  ;;  %p2612_p8 = scmp.ne.s32.totalorder %s5119_s20, 0 }
 0x10b   : > { %v3983_v0 = vmov (!%p2612_p8), 0.0  }
 0x10c   : > { %s5180_s11 = smov (!%p454_p7, %s2610_s11), 127  ;;  %463 = sbr.rel (%p2612_p8) target bundleno = 285 (0x11d), region = 76 }
 0x10d   : > { %s2611_s30 = sshll.u32 %s5180_s11, 3  ;;  %464 = vst [vmem:[#allocation2] sm:$0xff] (!%p2612_p8), %v3983_v0  ;;  %465 = vst [vmem:[#allocation2 + $0x8] sm:$0xff] (!%p2612_p8), %v3983_v0 }
 0x10e   : > { %s4461_s22 = scalar_lea.vmem %s5118_s6, %s2611_s30  ;;  %466 = vst [vmem:[#allocation2 + $0x10] sm:$0xff] (!%p2612_p8), %v3983_v0  ;;  %467 = vst [vmem:[#allocation2 + $0x18] sm:$0xff] (!%p2612_p8), %v3983_v0 }
 0x10f   : > { %468 = vst [vmem:[#allocation2 + $0x20] sm:$0xff] (!%p2612_p8), %v3983_v0  ;;  %469 = vst [vmem:[#allocation2 + $0x28] sm:$0xff] (!%p2612_p8), %v3983_v0 }
 0x110   : > { %470 = vst [vmem:[#allocation2 + $0x30] sm:$0xff] (!%p2612_p8), %v3983_v0  ;;  %471 = vst [vmem:[#allocation2 + $0x38] sm:$0xff] (!%p2612_p8), %v3983_v0 }
 0x111   : > { %472 = vst [vmem:[#allocation2 + $0x40] sm:$0xff] (!%p2612_p8), %v3983_v0  ;;  %473 = vst [vmem:[#allocation2 + $0x48] sm:$0xff] (!%p2612_p8), %v3983_v0 }
 0x112   : > { %474 = vst [vmem:[#allocation2 + $0x50] sm:$0xff] (!%p2612_p8), %v3983_v0  ;;  %475 = vst [vmem:[#allocation2 + $0x58] sm:$0xff] (!%p2612_p8), %v3983_v0 }
 0x113   : > { %476 = vst [vmem:[#allocation2 + $0x60] sm:$0xff] %v3983_v0  ;;  %477 = vst [vmem:[#allocation2 + $0x68] sm:$0xff] %v3983_v0 }
 0x114   : > { %478 = vst [vmem:[#allocation2 + $0x70] sm:$0xff] %v3983_v0  ;;  %479 = vst [vmem:[#allocation2 + $0x78] sm:$0xff] %v3983_v0 }
 0x115   : > { %480 = vst [vmem:[#allocation2 + $0x80] sm:$0xff] %v3983_v0  ;;  %481 = vst [vmem:[#allocation2 + $0x88] sm:$0xff] %v3983_v0 }
 0x116   : > { %482 = vst [vmem:[#allocation2 + $0x90] sm:$0xff] %v3983_v0  ;;  %483 = vst [vmem:[#allocation2 + $0x98] sm:$0xff] %v3983_v0 }
 0x117   : > { %484 = vst [vmem:[#allocation2 + $0xa0] sm:$0xff] %v3983_v0  ;;  %485 = vst [vmem:[#allocation2 + $0xa8] sm:$0xff] %v3983_v0 }
 0x118   : > { %486 = vst [vmem:[#allocation2 + $0xb0] sm:$0xff] %v3983_v0  ;;  %487 = vst [vmem:[#allocation2 + $0xb8] sm:$0xff] %v3983_v0 }
 0x119   : > { %488 = vst [vmem:[#allocation2 + $0xc0] sm:$0xff] %v3983_v0  ;;  %489 = vst [vmem:[#allocation2 + $0xc8] sm:$0xff] %v3983_v0 }
 0x11a   : > { %490 = vst [vmem:[#allocation2 + $0xd0] sm:$0xff] %v3983_v0  ;;  %491 = vst [vmem:[#allocation2 + $0xd8] sm:$0xff] %v3983_v0 }
 0x11b   : > { %492 = vst [vmem:[#allocation2 + $0xe0] sm:$0xff] %v3983_v0  ;;  %493 = vst [vmem:[#allocation2 + $0xe8] sm:$0xff] %v3983_v0 }
 0x11c   : > { %494 = vst [vmem:[#allocation2 + $0xf0] sm:$0xff] %v3983_v0  ;;  %495 = vst [vmem:[#allocation2 + $0xf8] sm:$0xff] %v3983_v0 }
 0x11d PF: > { %v608_v1 = vld [vmem:[%s4434_s10 + $0x80] sm:$0xff]  ;;  %v609_v2 = vld [vmem:[%s4434_s10 + $0x88] sm:$0xff]  ;;  %v610_v12 = vld [vmem:[%s4434_s10 + $0x90] sm:$0xff]  ;;  %s5120_s15 = sld [smem:[#allocation23_spill]] }
 0x11e   : > { %v640_v3 = vld [vmem:[%s4434_s10 + $0x180] sm:$0xff]  ;;  %v3200_v4 = vpack.c.bf16 %v609_v2, %v608_v1  ;;  %v641_v5 = vld [vmem:[%s4434_s10 + $0x188] sm:$0xff]  ;;  %v611_v14 = vld [vmem:[%s4434_s10 + $0x98] sm:$0xff] }
 0x11f   : > { %v592_v6 = vld [vmem:[%s4434_s10] sm:$0xff]  ;;  %v593_v7 = vld [vmem:[%s4434_s10 + $0x8] sm:$0xff]  ;;  %v3232_v8 = vpack.c.bf16 %v641_v5, %v640_v3  ;;  %v642_v15 = vld [vmem:[%s4434_s10 + $0x190] sm:$0xff]  ;;  %v3204_v17 = vpack.c.bf16 %v611_v14, %v610_v12 }
 0x120   : > { %v3202_v9 = vpack.c.bf16 %v593_v7, %v592_v6  ;;  %v624_v10 = vld [vmem:[%s4434_s10 + $0x100] sm:$0xff]  ;;  %v625_v11 = vld [vmem:[%s4434_s10 + $0x108] sm:$0xff]  ;;  %3201 = vmatprep.subr.bf16.mxu0 %v3200_v4  ;;  %v643_v16 = vld [vmem:[%s4434_s10 + $0x198] sm:$0xff] }
 0x121   : > { %v3234_v13 = vpack.c.bf16 %v625_v11, %v624_v10  ;;  %3233 = vmatprep.subr.bf16.mxu1 %v3232_v8  ;;  %v3236_v18 = vpack.c.bf16 %v643_v16, %v642_v15  ;;  %v594_v19 = vld [vmem:[%s4434_s10 + $0x10] sm:$0xff]  ;;  %v595_v20 = vld [vmem:[%s4434_s10 + $0x18] sm:$0xff]  ;;  %v612_v24 = vld [vmem:[%s4434_s10 + $0xa0] sm:$0xff] }
 0x122   : > { %3203 = vmatpush3.bf16.msra.mxu0 %v3202_v9  ;;  %v626_v21 = vld [vmem:[%s4434_s10 + $0x110] sm:$0xff]  ;;  %v3206_v22 = vpack.c.bf16 %v595_v20, %v594_v19  ;;  %v627_v23 = vld [vmem:[%s4434_s10 + $0x118] sm:$0xff]  ;;  %v613_v25 = vld [vmem:[%s4434_s10 + $0xa8] sm:$0xff] }
 0x123   : > { %3235 = vmatpush3.bf16.msra.mxu1 %v3234_v13  ;;  %3205 = vmatprep.subr.bf16.mxu0 %v3204_v17  ;;  %v3238_v26 = vpack.c.bf16 %v627_v23, %v626_v21  ;;  %v3208_v27 = vpack.c.bf16 %v613_v25, %v612_v24  ;;  %v644_v28 = vld [vmem:[%s4434_s10 + $0x1a0] sm:$0xff]  ;;  %v645_v29 = vld [vmem:[%s4434_s10 + $0x1a8] sm:$0xff]  ;;  %v614_v36 = vld [vmem:[%s4434_s10 + $0xb0] sm:$0xff]  ;;  %p2677_p4 = scmp.ne.s32.totalorder %s5120_s15, 1 }
 0x124   : > { %3237 = vmatprep.subr.bf16.mxu1 %v3236_v18  ;;  %v596_v30 = vld [vmem:[%s4434_s10 + $0x20] sm:$0xff]  ;;  %v3240_v31 = vpack.c.bf16 %v645_v29, %v644_v28  ;;  %v597_v32 = vld [vmem:[%s4434_s10 + $0x28] sm:$0xff]  ;;  %v615_v37 = vld [vmem:[%s4434_s10 + $0xb8] sm:$0xff] }
 0x125   : > { %v628_v33 = vld [vmem:[%s4434_s10 + $0x120] sm:$0xff]  ;;  %v629_v34 = vld [vmem:[%s4434_s10 + $0x128] sm:$0xff]  ;;  %v3210_v35 = vpack.c.bf16 %v597_v32, %v596_v30  ;;  %v646_v38 = vld [vmem:[%s4434_s10 + $0x1b0] sm:$0xff]  ;;  %v3212_v40 = vpack.c.bf16 %v615_v37, %v614_v36 }
 0x126   : > { %3207 = vmatpush3.bf16.msra.mxu0 %v3206_v22  ;;  %v3242_v39 = vpack.c.bf16 %v629_v34, %v628_v33  ;;  %v647_v41 = vld [vmem:[%s4434_s10 + $0x1b8] sm:$0xff]  ;;  %v598_v42 = vld [vmem:[%s4434_s10 + $0x30] sm:$0xff]  ;;  %v616_v47 = vld [vmem:[%s4434_s10 + $0xc0] sm:$0xff] }
 0x127   : > { %3239 = vmatpush3.bf16.msra.mxu1 %v3238_v26  ;;  %3209 = vmatprep.subr.bf16.mxu0 %v3208_v27  ;;  %v599_v43 = vld [vmem:[%s4434_s10 + $0x38] sm:$0xff]  ;;  %v3244_v44 = vpack.c.bf16 %v647_v41, %v646_v38  ;;  %v630_v45 = vld [vmem:[%s4434_s10 + $0x130] sm:$0xff]  ;;  %v617_v48 = vld [vmem:[%s4434_s10 + $0xc8] sm:$0xff] }
 0x128   : > { %3241 = vmatprep.subr.bf16.mxu1 %v3240_v31  ;;  %v631_v46 = vld [vmem:[%s4434_s10 + $0x138] sm:$0xff]  ;;  %v648_v49 = vld [vmem:[%s4434_s10 + $0x1c0] sm:$0xff]  ;;  %v649_v50 = vld [vmem:[%s4434_s10 + $0x1c8] sm:$0xff]  ;;  %v3214_v51 = vpack.c.bf16 %v599_v43, %v598_v42  ;;  %v3216_v53 = vpack.c.bf16 %v617_v48, %v616_v47 }
 0x129   : > { %v3246_v52 = vpack.c.bf16 %v631_v46, %v630_v45  ;;  %v600_v54 = vld [vmem:[%s4434_s10 + $0x40] sm:$0xff]  ;;  %v601_v55 = vld [vmem:[%s4434_s10 + $0x48] sm:$0xff]  ;;  %v3248_v57 = vpack.c.bf16 %v649_v50, %v648_v49  ;;  %v618_v59 = vld [vmem:[%s4434_s10 + $0xd0] sm:$0xff] }
 0x12a   : > { %3211 = vmatpush3.bf16.msra.mxu0 %v3210_v35  ;;  %v632_v56 = vld [vmem:[%s4434_s10 + $0x140] sm:$0xff]  ;;  %v633_v58 = vld [vmem:[%s4434_s10 + $0x148] sm:$0xff]  ;;  %v619_v60 = vld [vmem:[%s4434_s10 + $0xd8] sm:$0xff]  ;;  %v3218_v63 = vpack.c.bf16 %v601_v55, %v600_v54 }
 0x12b   : > { %3243 = vmatpush3.bf16.msra.mxu1 %v3242_v39  ;;  %3213 = vmatprep.subr.bf16.mxu0 %v3212_v40  ;;  %v650_v61 = vld [vmem:[%s4434_s10 + $0x1d0] sm:$0xff]  ;;  %v651_v62 = vld [vmem:[%s4434_s10 + $0x1d8] sm:$0xff]  ;;  %v3250_v1 = vpack.c.bf16 %v633_v58, %v632_v56  ;;  %v3220_v2 = vpack.c.bf16 %v619_v60, %v618_v59  ;;  %v620_v7 = vld [vmem:[%s4434_s10 + $0xe0] sm:$0xff] }
 0x12c   : > { %3245 = vmatprep.subr.bf16.mxu1 %v3244_v44  ;;  %v602_v0 = vld [vmem:[%s4434_s10 + $0x50] sm:$0xff]  ;;  %v603_v3 = vld [vmem:[%s4434_s10 + $0x58] sm:$0xff]  ;;  %v3252_v6 = vpack.c.bf16 %v651_v62, %v650_v61  ;;  %v621_v8 = vld [vmem:[%s4434_s10 + $0xe8] sm:$0xff] }
 0x12d   : > { %v634_v4 = vld [vmem:[%s4434_s10 + $0x150] sm:$0xff]  ;;  %v635_v5 = vld [vmem:[%s4434_s10 + $0x158] sm:$0xff]  ;;  %v652_v9 = vld [vmem:[%s4434_s10 + $0x1e0] sm:$0xff]  ;;  %v3222_v13 = vpack.c.bf16 %v603_v3, %v602_v0  ;;  %v3224_v18 = vpack.c.bf16 %v621_v8, %v620_v7 }
 0x12e   : > { %3215 = vmatpush3.bf16.msra.mxu0 %v3214_v51  ;;  %v653_v10 = vld [vmem:[%s4434_s10 + $0x1e8] sm:$0xff]  ;;  %v604_v11 = vld [vmem:[%s4434_s10 + $0x60] sm:$0xff]  ;;  %v622_v16 = vld [vmem:[%s4434_s10 + $0xf0] sm:$0xff]  ;;  %v3254_v17 = vpack.c.bf16 %v635_v5, %v634_v4 }
 0x12f   : > { %3247 = vmatpush3.bf16.msra.mxu1 %v3246_v52  ;;  %3217 = vmatprep.subr.bf16.mxu0 %v3216_v53  ;;  %v605_v12 = vld [vmem:[%s4434_s10 + $0x68] sm:$0xff]  ;;  %v636_v14 = vld [vmem:[%s4434_s10 + $0x160] sm:$0xff]  ;;  %v623_v19 = vld [vmem:[%s4434_s10 + $0xf8] sm:$0xff]  ;;  %v3256_v20 = vpack.c.bf16 %v653_v10, %v652_v9 }
 0x130   : > { %3249 = vmatprep.subr.bf16.mxu1 %v3248_v57  ;;  %v637_v15 = vld [vmem:[%s4434_s10 + $0x168] sm:$0xff]  ;;  %v654_v21 = vld [vmem:[%s4434_s10 + $0x1f0] sm:$0xff]  ;;  %v655_v23 = vld [vmem:[%s4434_s10 + $0x1f8] sm:$0xff]  ;;  %v3226_v25 = vpack.c.bf16 %v605_v12, %v604_v11  ;;  %v3228_v28 = vpack.c.bf16 %v623_v19, %v622_v16 }
 0x131   : > { %v3538_v22 = vld [vmem:[%s4426_s17 + $0x4] ss:$16 sps:$4 sm:$0xff]   ;;  %v3541_v24 = vld [vmem:[%s4426_s17 + $0xc] ss:$16 sps:$4 sm:$0xff]   ;;  %v3258_v27 = vpack.c.bf16 %v637_v15, %v636_v14  ;;  %v3260_v30 = vpack.c.bf16 %v655_v23, %v654_v21  ;;  %v3536_v35 = vld [vmem:[%s4426_s17] ss:$16 sps:$4 sm:$0xff]  }
 0x132   : > { %3219 = vmatpush3.bf16.msra.mxu0 %v3218_v63  ;;  %v606_v26 = vld [vmem:[%s4434_s10 + $0x70] sm:$0xff]  ;;  %1040 = vmatprep.mubr.bf16.mxu0 %v3538_v22  ;;  %v607_v29 = vld [vmem:[%s4434_s10 + $0x78] sm:$0xff] }
 0x133   : > { %3251 = vmatpush3.bf16.msra.mxu1 %v3250_v1  ;;  %3221 = vmatprep.subr.bf16.mxu0 %v3220_v2  ;;  %v638_v31 = vld [vmem:[%s4434_s10 + $0x170] sm:$0xff]  ;;  %v639_v32 = vld [vmem:[%s4434_s10 + $0x178] sm:$0xff]  ;;  %v3230_v33 = vpack.c.bf16 %v607_v29, %v606_v26 }
 0x134   : > { %3253 = vmatprep.subr.bf16.mxu1 %v3252_v6  ;;  %1233 = vmatprep.mubr.bf16.mxu1 %v3541_v24  ;;  %v3262_v34 = vpack.c.bf16 %v639_v32, %v638_v31  ;;  %v3539_v36 = vld [vmem:[%s4426_s17 + $0x8] ss:$16 sps:$4 sm:$0xff]   ;;  %v3542_v37 = vld [vmem:[%s4426_s17 + $0x24] ss:$16 sps:$4 sm:$0xff]   ;;  %v3544_v38 = vld [vmem:[%s4426_s17 + $0x2c] ss:$16 sps:$4 sm:$0xff]  }
 0x135   : > { %v3546_v39 = vld [vmem:[%s4426_s17 + $0x20] ss:$16 sps:$4 sm:$0xff]   ;;  %v3547_v40 = vld [vmem:[%s4426_s17 + $0x28] ss:$16 sps:$4 sm:$0xff]   ;;  %v3548_v41 = vld [vmem:[%s4426_s17 + $0x44] ss:$16 sps:$4 sm:$0xff]  }
 0x136   : > { %3223 = vmatpush3.bf16.msra.mxu0 %v3222_v13  ;;  %v3550_v42 = vld [vmem:[%s4426_s17 + $0x4c] ss:$16 sps:$4 sm:$0xff]   ;;  %v3552_v43 = vld [vmem:[%s4426_s17 + $0x40] ss:$16 sps:$4 sm:$0xff]   ;;  %v3553_v44 = vld [vmem:[%s4426_s17 + $0x48] ss:$16 sps:$4 sm:$0xff]  }
 0x137   : > { %3255 = vmatpush3.bf16.msra.mxu1 %v3254_v17  ;;  %3225 = vmatprep.subr.bf16.mxu0 %v3224_v18  ;;  %v3554_v45 = vld [vmem:[%s4426_s17 + $0x64] ss:$16 sps:$4 sm:$0xff]   ;;  %v3556_v46 = vld [vmem:[%s4426_s17 + $0x6c] ss:$16 sps:$4 sm:$0xff]   ;;  %v3558_v47 = vld [vmem:[%s4426_s17 + $0x60] ss:$16 sps:$4 sm:$0xff]  }
 0x138   : > { %3257 = vmatprep.subr.bf16.mxu1 %v3256_v20  ;;  %v3559_v48 = vld [vmem:[%s4426_s17 + $0x68] ss:$16 sps:$4 sm:$0xff]   ;;  %v3560_v49 = vld [vmem:[%s4426_s17 + $0x84] ss:$16 sps:$4 sm:$0xff]   ;;  %v3562_v50 = vld [vmem:[%s4426_s17 + $0x8c] ss:$16 sps:$4 sm:$0xff]  }
 0x139   : > { %v3564_v51 = vld [vmem:[%s4426_s17 + $0x80] ss:$16 sps:$4 sm:$0xff]   ;;  %v3565_v52 = vld [vmem:[%s4426_s17 + $0x88] ss:$16 sps:$4 sm:$0xff]   ;;  %v3566_v53 = vld [vmem:[%s4426_s17 + $0xa4] ss:$16 sps:$4 sm:$0xff]  }
 0x13a   : > { %3227 = vmatpush3.bf16.msra.mxu0 %v3226_v25  ;;  %v3568_v54 = vld [vmem:[%s4426_s17 + $0xac] ss:$16 sps:$4 sm:$0xff]   ;;  %v3570_v55 = vld [vmem:[%s4426_s17 + $0xa0] ss:$16 sps:$4 sm:$0xff]   ;;  %v3571_v56 = vld [vmem:[%s4426_s17 + $0xa8] ss:$16 sps:$4 sm:$0xff]  }
 0x13b   : > { %3259 = vmatpush3.bf16.msra.mxu1 %v3258_v27  ;;  %3229 = vmatprep.subr.bf16.mxu0 %v3228_v28  ;;  %v3572_v57 = vld [vmem:[%s4426_s17 + $0xc4] ss:$16 sps:$4 sm:$0xff]   ;;  %v3574_v58 = vld [vmem:[%s4426_s17 + $0xcc] ss:$16 sps:$4 sm:$0xff]   ;;  %v3576_v59 = vld [vmem:[%s4426_s17 + $0xc0] ss:$16 sps:$4 sm:$0xff]  }
 0x13c   : > { %3261 = vmatprep.subr.bf16.mxu1 %v3260_v30  ;;  %v3577_v60 = vld [vmem:[%s4426_s17 + $0xc8] ss:$16 sps:$4 sm:$0xff]   ;;  %v3578_v61 = vld [vmem:[%s4426_s17 + $0xe4] ss:$16 sps:$4 sm:$0xff]   ;;  %v3580_v62 = vld [vmem:[%s4426_s17 + $0xec] ss:$16 sps:$4 sm:$0xff]  }
 0x13d   : > { %v3582_v63 = vld [vmem:[%s4426_s17 + $0xe0] ss:$16 sps:$4 sm:$0xff]   ;;  %v3583_v0 = vld [vmem:[%s4426_s17 + $0xe8] ss:$16 sps:$4 sm:$0xff]   ;;  %v3584_v1 = vld [vmem:[%s4426_s17 + $0x104] ss:$16 sps:$4 sm:$0xff]  }
 0x13e   : > { %3231 = vmatpush3.bf16.msra.mxu0 %v3230_v33  ;;  %v3586_v2 = vld [vmem:[%s4426_s17 + $0x10c] ss:$16 sps:$4 sm:$0xff]   ;;  %v3588_v3 = vld [vmem:[%s4426_s17 + $0x100] ss:$16 sps:$4 sm:$0xff]   ;;  %v3589_v4 = vld [vmem:[%s4426_s17 + $0x108] ss:$16 sps:$4 sm:$0xff]  }
 0x13f   : > { %3263 = vmatpush3.bf16.msra.mxu1 %v3262_v34  ;;  %v3590_v5 = vld [vmem:[%s4426_s17 + $0x124] ss:$16 sps:$4 sm:$0xff]   ;;  %v3592_v6 = vld [vmem:[%s4426_s17 + $0x12c] ss:$16 sps:$4 sm:$0xff]   ;;  %v3594_v7 = vld [vmem:[%s4426_s17 + $0x120] ss:$16 sps:$4 sm:$0xff]  }
 0x140   : > { %v3595_v8 = vld [vmem:[%s4426_s17 + $0x128] ss:$16 sps:$4 sm:$0xff]   ;;  %v3596_v9 = vld [vmem:[%s4426_s17 + $0x144] ss:$16 sps:$4 sm:$0xff]   ;;  %v3598_v10 = vld [vmem:[%s4426_s17 + $0x14c] ss:$16 sps:$4 sm:$0xff]  }
 0x141   : > { %1041 = vmatmul.mubr.bf16.vlgmr.msra.gmra.mrb[0].mxu0 %v3536_v35  ;;  %v3600_v11 = vld [vmem:[%s4426_s17 + $0x140] ss:$16 sps:$4 sm:$0xff]   ;;  %v3601_v12 = vld [vmem:[%s4426_s17 + $0x148] ss:$16 sps:$4 sm:$0xff]   ;;  %v3602_v13 = vld [vmem:[%s4426_s17 + $0x164] ss:$16 sps:$4 sm:$0xff]  }
 0x142   : > { %1234 = vmatmul.mubr.bf16.vlgmr.msra.gmra.mrb[0].mxu1 %v3539_v36  ;;  %1048 = vmatprep.mubr.bf16.mxu0 %v3542_v37  ;;  %v3604_v14 = vld [vmem:[%s4426_s17 + $0x16c] ss:$16 sps:$4 sm:$0xff]   ;;  %v3606_v15 = vld [vmem:[%s4426_s17 + $0x160] ss:$16 sps:$4 sm:$0xff]   ;;  %v3607_v16 = vld [vmem:[%s4426_s17 + $0x168] ss:$16 sps:$4 sm:$0xff]  }
 0x143   : > { %1241 = vmatprep.mubr.bf16.mxu1 %v3544_v38  ;;  %v3608_v17 = vld [vmem:[%s4426_s17 + $0x184] ss:$16 sps:$4 sm:$0xff]   ;;  %v3610_v18 = vld [vmem:[%s4426_s17 + $0x18c] ss:$16 sps:$4 sm:$0xff]   ;;  %v3612_v19 = vld [vmem:[%s4426_s17 + $0x180] ss:$16 sps:$4 sm:$0xff]  }
 0x144   : > { %v3613_v20 = vld [vmem:[%s4426_s17 + $0x188] ss:$16 sps:$4 sm:$0xff]   ;;  %v3614_v21 = vld [vmem:[%s4426_s17 + $0x1a4] ss:$16 sps:$4 sm:$0xff]   ;;  %v3616_v22 = vld [vmem:[%s4426_s17 + $0x1ac] ss:$16 sps:$4 sm:$0xff]  }
 0x145   : > { %v3618_v23 = vld [vmem:[%s4426_s17 + $0x1a0] ss:$16 sps:$4 sm:$0xff]   ;;  %v3619_v24 = vld [vmem:[%s4426_s17 + $0x1a8] ss:$16 sps:$4 sm:$0xff]   ;;  %v3620_v25 = vld [vmem:[%s4426_s17 + $0x1c4] ss:$16 sps:$4 sm:$0xff]  }
 0x146   : > { %v3622_v26 = vld [vmem:[%s4426_s17 + $0x1cc] ss:$16 sps:$4 sm:$0xff]   ;;  %v3624_v27 = vld [vmem:[%s4426_s17 + $0x1c0] ss:$16 sps:$4 sm:$0xff]   ;;  %v3625_v28 = vld [vmem:[%s4426_s17 + $0x1c8] ss:$16 sps:$4 sm:$0xff]  }
 0x147   : > { %v3626_v29 = vld [vmem:[%s4426_s17 + $0x1e4] ss:$16 sps:$4 sm:$0xff]   ;;  %v3628_v30 = vld [vmem:[%s4426_s17 + $0x1ec] ss:$16 sps:$4 sm:$0xff]   ;;  %v3630_v31 = vld [vmem:[%s4426_s17 + $0x1e0] ss:$16 sps:$4 sm:$0xff]  }
 0x148   : > { %v3631_v32 = vld [vmem:[%s4426_s17 + $0x1e8] ss:$16 sps:$4 sm:$0xff]  }
 0x149   : > { %1049 = vmatmul.mubr.bf16.gmra.mrb[4].mxu0 %v3546_v39 }
 0x14a   : > { %1242 = vmatmul.mubr.bf16.gmra.mrb[4].mxu1 %v3547_v40  ;;  %1056 = vmatprep.mubr.bf16.mxu0 %v3548_v41 }
 0x14b   : > { %1249 = vmatprep.mubr.bf16.mxu1 %v3550_v42  ;;  %v496_v42 = vld [vmem:[#allocation2] sm:$0xff] }
 0x151   : > { %1057 = vmatmul.mubr.bf16.gmra.mrb[8].mxu0 %v3552_v43 }
 0x152   : > { %1250 = vmatmul.mubr.bf16.gmra.mrb[8].mxu1 %v3553_v44  ;;  %1064 = vmatprep.mubr.bf16.mxu0 %v3554_v45 }
 0x153   : > { %1257 = vmatprep.mubr.bf16.mxu1 %v3556_v46 }
 0x159   : > { %1065 = vmatmul.mubr.bf16.gmra.mrb[12].mxu0 %v3558_v47  ;;  %v497_v47 = vld [vmem:[#allocation2 + $0x8] sm:$0xff] }
 0x15a   : > { %1258 = vmatmul.mubr.bf16.gmra.mrb[12].mxu1 %v3559_v48  ;;  %1072 = vmatprep.mubr.bf16.mxu0 %v3560_v49 }
 0x15b   : > { %1265 = vmatprep.mubr.bf16.mxu1 %v3562_v50 }
 0x161   : > { %1073 = vmatmul.mubr.bf16.gmra.mrb[16].mxu0 %v3564_v51 }
 0x162   : > { %1266 = vmatmul.mubr.bf16.gmra.mrb[16].mxu1 %v3565_v52  ;;  %1080 = vmatprep.mubr.bf16.mxu0 %v3566_v53 }
 0x163   : > { %1273 = vmatprep.mubr.bf16.mxu1 %v3568_v54 }
 0x169   : > { %1081 = vmatmul.mubr.bf16.gmra.mrb[20].mxu0 %v3570_v55 }
 0x16a   : > { %1274 = vmatmul.mubr.bf16.gmra.mrb[20].mxu1 %v3571_v56  ;;  %1088 = vmatprep.mubr.bf16.mxu0 %v3572_v57 }
 0x16b   : > { %1281 = vmatprep.mubr.bf16.mxu1 %v3574_v58 }
 0x171   : > { %1089 = vmatmul.mubr.bf16.gmra.mrb[24].mxu0 %v3576_v59 }
 0x172   : > { %1282 = vmatmul.mubr.bf16.gmra.mrb[24].mxu1 %v3577_v60  ;;  %1096 = vmatprep.mubr.bf16.mxu0 %v3578_v61  ;;  %v498_v60 = vld [vmem:[#allocation2 + $0x10] sm:$0xff] }
 0x173   : > { %1289 = vmatprep.mubr.bf16.mxu1 %v3580_v62 }
 0x179   : > { %1097 = vmatmul.mubr.bf16.gmra.mrb[28].mxu0 %v3582_v63 }
 0x17a   : > { %1290 = vmatmul.mubr.bf16.gmra.mrb[28].mxu1 %v3583_v0  ;;  %1104 = vmatprep.mubr.bf16.mxu0 %v3584_v1  ;;  %v499_v1 = vld [vmem:[#allocation2 + $0x18] sm:$0xff] }
 0x17b   : > { %1297 = vmatprep.mubr.bf16.mxu1 %v3586_v2 }
 0x181   : > { %1105 = vmatmul.mubr.bf16.gmra.mrb[32].mxu0 %v3588_v3 }
 0x182   : > { %1298 = vmatmul.mubr.bf16.gmra.mrb[32].mxu1 %v3589_v4  ;;  %1112 = vmatprep.mubr.bf16.mxu0 %v3590_v5 }
 0x183   : > { %1305 = vmatprep.mubr.bf16.mxu1 %v3592_v6 }
 0x189   : > { %1113 = vmatmul.mubr.bf16.gmra.mrb[36].mxu0 %v3594_v7 }
 0x18a   : > { %1306 = vmatmul.mubr.bf16.gmra.mrb[36].mxu1 %v3595_v8  ;;  %1120 = vmatprep.mubr.bf16.mxu0 %v3596_v9 }
 0x18b   : > { %1313 = vmatprep.mubr.bf16.mxu1 %v3598_v10 }
 0x191   : > { %1121 = vmatmul.mubr.bf16.gmra.mrb[40].mxu0 %v3600_v11 }
 0x192   : > { %1314 = vmatmul.mubr.bf16.gmra.mrb[40].mxu1 %v3601_v12  ;;  %1128 = vmatprep.mubr.bf16.mxu0 %v3602_v13 }
 0x193   : > { %1321 = vmatprep.mubr.bf16.mxu1 %v3604_v14  ;;  %v500_v14 = vld [vmem:[#allocation2 + $0x20] sm:$0xff] }
 0x199   : > { %1129 = vmatmul.mubr.bf16.gmra.mrb[44].mxu0 %v3606_v15 }
 0x19a   : > { %1322 = vmatmul.mubr.bf16.gmra.mrb[44].mxu1 %v3607_v16  ;;  %1136 = vmatprep.mubr.bf16.mxu0 %v3608_v17 }
 0x19b   : > { %1329 = vmatprep.mubr.bf16.mxu1 %v3610_v18 }
 0x1a1   : > { %1137 = vmatmul.mubr.bf16.gmra.mrb[48].mxu0 %v3612_v19  ;;  %v501_v19 = vld [vmem:[#allocation2 + $0x28] sm:$0xff] }
 0x1a2   : > { %1330 = vmatmul.mubr.bf16.gmra.mrb[48].mxu1 %v3613_v20  ;;  %1144 = vmatprep.mubr.bf16.mxu0 %v3614_v21 }
 0x1a3   : > { %1337 = vmatprep.mubr.bf16.mxu1 %v3616_v22 }
 0x1a9   : > { %1145 = vmatmul.mubr.bf16.gmra.mrb[52].mxu0 %v3618_v23 }
 0x1aa   : > { %1338 = vmatmul.mubr.bf16.gmra.mrb[52].mxu1 %v3619_v24  ;;  %1152 = vmatprep.mubr.bf16.mxu0 %v3620_v25 }
 0x1ab   : > { %1345 = vmatprep.mubr.bf16.mxu1 %v3622_v26 }
 0x1b1   : > { %1153 = vmatmul.mubr.bf16.gmra.mrb[56].mxu0 %v3624_v27 }
 0x1b2   : > { %1346 = vmatmul.mubr.bf16.gmra.mrb[56].mxu1 %v3625_v28  ;;  %1160 = vmatprep.mubr.bf16.mxu0 %v3626_v29 }
 0x1b3   : > { %1353 = vmatprep.mubr.bf16.mxu1 %v3628_v30 }
 0x1b9   : > { %1161 = vmatmul.mubr.bf16.gmra.mrb[60].mxu0 %v3630_v31 }
 0x1ba   : > { %1354 = vmatmul.mubr.bf16.gmra.mrb[60].mxu1 %v3631_v32  ;;  %v502_v32 = vld [vmem:[#allocation2 + $0x30] sm:$0xff] }
 0x214   : > { %v2720_v33 = vpop.f32.mrb[0].mxu0 }
 0x215   : > { %v2848_v34 = vpop.f32.mrb[0].mxu1  ;;  %v2721_v35 = vpop.f32.mrb[1].mxu0 }
 0x216   : > { %v2722_v36 = vadd.f32 %v2721_v35, %v2720_v33  ;;  %v2849_v37 = vpop.f32.mrb[1].mxu1  ;;  %v2723_v38 = vpop.f32.mrb[2].mxu0 }
 0x217   : > { %v2850_v39 = vadd.f32 %v2849_v37, %v2848_v34  ;;  %v2851_v40 = vpop.f32.mrb[2].mxu1  ;;  %v2724_v41 = vpop.f32.mrb[3].mxu0  ;;  %v503_v37 = vld [vmem:[#allocation2 + $0x38] sm:$0xff] }
 0x218   : > { %v2725_v43 = vadd.f32 %v2724_v41, %v2723_v38  ;;  %v2852_v44 = vpop.f32.mrb[3].mxu1 }
 0x219   : > { %v1236_v45 = vadd.f32 %v2850_v39, %v2722_v36  ;;  %v2853_v46 = vadd.f32 %v2852_v44, %v2851_v40 }
 0x21b   : > { %v1362_v48 = vadd.f32 %v1236_v45, %v496_v42  ;;  %v1239_v49 = vadd.f32 %v2853_v46, %v2725_v43 }
 0x21c   : > { %v2726_v50 = vpop.f32.mrb[4].mxu0 }
 0x21d   : > { %1394 = vst [vmem:[#allocation2] sm:$0xff] %v1362_v48  ;;  %v1363_v51 = vadd.f32 %v1239_v49, %v497_v47  ;;  %v2854_v52 = vpop.f32.mrb[4].mxu1  ;;  %v2727_v53 = vpop.f32.mrb[5].mxu0 }
 0x21e   : > { %v2728_v54 = vadd.f32 %v2727_v53, %v2726_v50  ;;  %v2855_v55 = vpop.f32.mrb[5].mxu1  ;;  %v2729_v56 = vpop.f32.mrb[6].mxu0  ;;  %v504_v50 = vld [vmem:[#allocation2 + $0x40] sm:$0xff] }
 0x21f   : > { %1395 = vst [vmem:[#allocation2 + $0x8] sm:$0xff] %v1363_v51  ;;  %v2856_v57 = vadd.f32 %v2855_v55, %v2854_v52  ;;  %v2857_v58 = vpop.f32.mrb[6].mxu1  ;;  %v2730_v59 = vpop.f32.mrb[7].mxu0  ;;  %v505_v55 = vld [vmem:[#allocation2 + $0x48] sm:$0xff] }
 0x220   : > { %v2731_v61 = vadd.f32 %v2730_v59, %v2729_v56  ;;  %v2858_v62 = vpop.f32.mrb[7].mxu1 }
 0x221   : > { %v1244_v63 = vadd.f32 %v2856_v57, %v2728_v54  ;;  %v2859_v0 = vadd.f32 %v2858_v62, %v2857_v58 }
 0x223   : > { %v1364_v2 = vadd.f32 %v1244_v63, %v498_v60  ;;  %v1247_v3 = vadd.f32 %v2859_v0, %v2731_v61 }
 0x224   : > { %v2732_v4 = vpop.f32.mrb[8].mxu0 }
 0x225   : > { %1396 = vst [vmem:[#allocation2 + $0x10] sm:$0xff] %v1364_v2  ;;  %v1365_v5 = vadd.f32 %v1247_v3, %v499_v1  ;;  %v2860_v6 = vpop.f32.mrb[8].mxu1  ;;  %v2733_v7 = vpop.f32.mrb[9].mxu0 }
 0x226   : > { %v2734_v8 = vadd.f32 %v2733_v7, %v2732_v4  ;;  %v2861_v9 = vpop.f32.mrb[9].mxu1  ;;  %v2735_v10 = vpop.f32.mrb[10].mxu0  ;;  %v506_v4 = vld [vmem:[#allocation2 + $0x50] sm:$0xff] }
 0x227   : > { %1397 = vst [vmem:[#allocation2 + $0x18] sm:$0xff] %v1365_v5  ;;  %v2862_v11 = vadd.f32 %v2861_v9, %v2860_v6  ;;  %v2863_v12 = vpop.f32.mrb[10].mxu1  ;;  %v2736_v13 = vpop.f32.mrb[11].mxu0  ;;  %v507_v9 = vld [vmem:[#allocation2 + $0x58] sm:$0xff] }
 0x228   : > { %v2737_v15 = vadd.f32 %v2736_v13, %v2735_v10  ;;  %v2864_v16 = vpop.f32.mrb[11].mxu1 }
 0x229   : > { %v1252_v17 = vadd.f32 %v2862_v11, %v2734_v8  ;;  %v2865_v18 = vadd.f32 %v2864_v16, %v2863_v12 }
 0x22b   : > { %v1366_v20 = vadd.f32 %v1252_v17, %v500_v14  ;;  %v1255_v21 = vadd.f32 %v2865_v18, %v2737_v15 }
 0x22c   : > { %v2738_v22 = vpop.f32.mrb[12].mxu0 }
 0x22d   : > { %1398 = vst [vmem:[#allocation2 + $0x20] sm:$0xff] %v1366_v20  ;;  %v1367_v23 = vadd.f32 %v1255_v21, %v501_v19  ;;  %v2866_v24 = vpop.f32.mrb[12].mxu1  ;;  %v2739_v25 = vpop.f32.mrb[13].mxu0 }
 0x22e   : > { %v2740_v26 = vadd.f32 %v2739_v25, %v2738_v22  ;;  %v2867_v27 = vpop.f32.mrb[13].mxu1  ;;  %v2741_v28 = vpop.f32.mrb[14].mxu0  ;;  %v508_v22 = vld [vmem:[#allocation2 + $0x60] sm:$0xff] }
 0x22f   : > { %1399 = vst [vmem:[#allocation2 + $0x28] sm:$0xff] %v1367_v23  ;;  %v2868_v29 = vadd.f32 %v2867_v27, %v2866_v24  ;;  %v2869_v30 = vpop.f32.mrb[14].mxu1  ;;  %v2742_v31 = vpop.f32.mrb[15].mxu0  ;;  %v509_v27 = vld [vmem:[#allocation2 + $0x68] sm:$0xff] }
 0x230   : > { %v2743_v33 = vadd.f32 %v2742_v31, %v2741_v28  ;;  %v2870_v34 = vpop.f32.mrb[15].mxu1 }
 0x231   : > { %v1260_v35 = vadd.f32 %v2868_v29, %v2740_v26  ;;  %v2871_v36 = vadd.f32 %v2870_v34, %v2869_v30 }
 0x233   : > { %v1368_v38 = vadd.f32 %v1260_v35, %v502_v32  ;;  %v1263_v39 = vadd.f32 %v2871_v36, %v2743_v33 }
 0x234   : > { %v2744_v40 = vpop.f32.mrb[16].mxu0 }
 0x235   : > { %1400 = vst [vmem:[#allocation2 + $0x30] sm:$0xff] %v1368_v38  ;;  %v1369_v41 = vadd.f32 %v1263_v39, %v503_v37  ;;  %v2872_v42 = vpop.f32.mrb[16].mxu1  ;;  %v2745_v43 = vpop.f32.mrb[17].mxu0 }
 0x236   : > { %v2746_v44 = vadd.f32 %v2745_v43, %v2744_v40  ;;  %v2873_v45 = vpop.f32.mrb[17].mxu1  ;;  %v2747_v46 = vpop.f32.mrb[18].mxu0  ;;  %v510_v40 = vld [vmem:[#allocation2 + $0x70] sm:$0xff] }
 0x237   : > { %1401 = vst [vmem:[#allocation2 + $0x38] sm:$0xff] %v1369_v41  ;;  %v2874_v47 = vadd.f32 %v2873_v45, %v2872_v42  ;;  %v2875_v48 = vpop.f32.mrb[18].mxu1  ;;  %v2748_v49 = vpop.f32.mrb[19].mxu0  ;;  %v511_v45 = vld [vmem:[#allocation2 + $0x78] sm:$0xff] }
 0x238   : > { %v2749_v51 = vadd.f32 %v2748_v49, %v2747_v46  ;;  %v2876_v52 = vpop.f32.mrb[19].mxu1 }
 0x239   : > { %v1268_v53 = vadd.f32 %v2874_v47, %v2746_v44  ;;  %v2877_v54 = vadd.f32 %v2876_v52, %v2875_v48 }
 0x23b   : > { %v1370_v56 = vadd.f32 %v1268_v53, %v504_v50  ;;  %v1271_v57 = vadd.f32 %v2877_v54, %v2749_v51 }
 0x23c   : > { %v2750_v58 = vpop.f32.mrb[20].mxu0 }
 0x23d   : > { %1402 = vst [vmem:[#allocation2 + $0x40] sm:$0xff] %v1370_v56  ;;  %v1371_v59 = vadd.f32 %v1271_v57, %v505_v55  ;;  %v2878_v60 = vpop.f32.mrb[20].mxu1  ;;  %v2751_v61 = vpop.f32.mrb[21].mxu0 }
 0x23e   : > { %v2752_v62 = vadd.f32 %v2751_v61, %v2750_v58  ;;  %v2879_v63 = vpop.f32.mrb[21].mxu1  ;;  %v2753_v0 = vpop.f32.mrb[22].mxu0  ;;  %v512_v58 = vld [vmem:[#allocation2 + $0x80] sm:$0xff] }
 0x23f   : > { %1403 = vst [vmem:[#allocation2 + $0x48] sm:$0xff] %v1371_v59  ;;  %v2880_v1 = vadd.f32 %v2879_v63, %v2878_v60  ;;  %v2881_v2 = vpop.f32.mrb[22].mxu1  ;;  %v2754_v3 = vpop.f32.mrb[23].mxu0  ;;  %v513_v63 = vld [vmem:[#allocation2 + $0x88] sm:$0xff] }
 0x240   : > { %v2755_v5 = vadd.f32 %v2754_v3, %v2753_v0  ;;  %v2882_v6 = vpop.f32.mrb[23].mxu1 }
 0x241   : > { %v1276_v7 = vadd.f32 %v2880_v1, %v2752_v62  ;;  %v2883_v8 = vadd.f32 %v2882_v6, %v2881_v2 }
 0x243   : > { %v1372_v10 = vadd.f32 %v1276_v7, %v506_v4  ;;  %v1279_v11 = vadd.f32 %v2883_v8, %v2755_v5 }
 0x244   : > { %v2756_v12 = vpop.f32.mrb[24].mxu0 }
 0x245   : > { %1404 = vst [vmem:[#allocation2 + $0x50] sm:$0xff] %v1372_v10  ;;  %v1373_v13 = vadd.f32 %v1279_v11, %v507_v9  ;;  %v2884_v14 = vpop.f32.mrb[24].mxu1  ;;  %v2757_v15 = vpop.f32.mrb[25].mxu0 }
 0x246   : > { %v2758_v16 = vadd.f32 %v2757_v15, %v2756_v12  ;;  %v2885_v17 = vpop.f32.mrb[25].mxu1  ;;  %v2759_v18 = vpop.f32.mrb[26].mxu0  ;;  %v514_v12 = vld [vmem:[#allocation2 + $0x90] sm:$0xff] }
 0x247   : > { %1405 = vst [vmem:[#allocation2 + $0x58] sm:$0xff] %v1373_v13  ;;  %v2886_v19 = vadd.f32 %v2885_v17, %v2884_v14  ;;  %v2887_v20 = vpop.f32.mrb[26].mxu1  ;;  %v2760_v21 = vpop.f32.mrb[27].mxu0  ;;  %v515_v17 = vld [vmem:[#allocation2 + $0x98] sm:$0xff] }
 0x248   : > { %v2761_v23 = vadd.f32 %v2760_v21, %v2759_v18  ;;  %v2888_v24 = vpop.f32.mrb[27].mxu1 }
 0x249   : > { %v1284_v25 = vadd.f32 %v2886_v19, %v2758_v16  ;;  %v2889_v26 = vadd.f32 %v2888_v24, %v2887_v20 }
 0x24b   : > { %v1374_v28 = vadd.f32 %v1284_v25, %v508_v22  ;;  %v1287_v29 = vadd.f32 %v2889_v26, %v2761_v23 }
 0x24c   : > { %v2762_v30 = vpop.f32.mrb[28].mxu0 }
 0x24d   : > { %1406 = vst [vmem:[#allocation2 + $0x60] sm:$0xff] %v1374_v28  ;;  %v1375_v31 = vadd.f32 %v1287_v29, %v509_v27  ;;  %v2890_v32 = vpop.f32.mrb[28].mxu1  ;;  %v2763_v33 = vpop.f32.mrb[29].mxu0 }
 0x24e   : > { %v2764_v34 = vadd.f32 %v2763_v33, %v2762_v30  ;;  %v2891_v35 = vpop.f32.mrb[29].mxu1  ;;  %v2765_v36 = vpop.f32.mrb[30].mxu0  ;;  %v516_v30 = vld [vmem:[#allocation2 + $0xa0] sm:$0xff] }
 0x24f   : > { %1407 = vst [vmem:[#allocation2 + $0x68] sm:$0xff] %v1375_v31  ;;  %v2892_v37 = vadd.f32 %v2891_v35, %v2890_v32  ;;  %v2893_v38 = vpop.f32.mrb[30].mxu1  ;;  %v2766_v39 = vpop.f32.mrb[31].mxu0  ;;  %v517_v35 = vld [vmem:[#allocation2 + $0xa8] sm:$0xff] }
 0x250   : > { %v2767_v41 = vadd.f32 %v2766_v39, %v2765_v36  ;;  %v2894_v42 = vpop.f32.mrb[31].mxu1 }
 0x251   : > { %v1292_v43 = vadd.f32 %v2892_v37, %v2764_v34  ;;  %v2895_v44 = vadd.f32 %v2894_v42, %v2893_v38 }
 0x253   : > { %v1376_v46 = vadd.f32 %v1292_v43, %v510_v40  ;;  %v1295_v47 = vadd.f32 %v2895_v44, %v2767_v41 }
 0x254   : > { %v2768_v48 = vpop.f32.mrb[32].mxu0 }
 0x255   : > { %1408 = vst [vmem:[#allocation2 + $0x70] sm:$0xff] %v1376_v46  ;;  %v1377_v49 = vadd.f32 %v1295_v47, %v511_v45  ;;  %v2896_v50 = vpop.f32.mrb[32].mxu1  ;;  %v2769_v51 = vpop.f32.mrb[33].mxu0 }
 0x256   : > { %v2770_v52 = vadd.f32 %v2769_v51, %v2768_v48  ;;  %v2897_v53 = vpop.f32.mrb[33].mxu1  ;;  %v2771_v54 = vpop.f32.mrb[34].mxu0  ;;  %v518_v48 = vld [vmem:[#allocation2 + $0xb0] sm:$0xff] }
 0x257   : > { %1409 = vst [vmem:[#allocation2 + $0x78] sm:$0xff] %v1377_v49  ;;  %v2898_v55 = vadd.f32 %v2897_v53, %v2896_v50  ;;  %v2899_v56 = vpop.f32.mrb[34].mxu1  ;;  %v2772_v57 = vpop.f32.mrb[35].mxu0  ;;  %v519_v53 = vld [vmem:[#allocation2 + $0xb8] sm:$0xff] }
 0x258   : > { %v2773_v59 = vadd.f32 %v2772_v57, %v2771_v54  ;;  %v2900_v60 = vpop.f32.mrb[35].mxu1 }
 0x259   : > { %v1300_v61 = vadd.f32 %v2898_v55, %v2770_v52  ;;  %v2901_v62 = vadd.f32 %v2900_v60, %v2899_v56 }
 0x25b   : > { %v1378_v0 = vadd.f32 %v1300_v61, %v512_v58  ;;  %v1303_v1 = vadd.f32 %v2901_v62, %v2773_v59 }
 0x25c   : > { %v2774_v2 = vpop.f32.mrb[36].mxu0 }
 0x25d   : > { %1410 = vst [vmem:[#allocation2 + $0x80] sm:$0xff] %v1378_v0  ;;  %v1379_v3 = vadd.f32 %v1303_v1, %v513_v63  ;;  %v2902_v4 = vpop.f32.mrb[36].mxu1  ;;  %v2775_v5 = vpop.f32.mrb[37].mxu0 }
 0x25e   : > { %v2776_v6 = vadd.f32 %v2775_v5, %v2774_v2  ;;  %v2903_v7 = vpop.f32.mrb[37].mxu1  ;;  %v2777_v8 = vpop.f32.mrb[38].mxu0  ;;  %v520_v2 = vld [vmem:[#allocation2 + $0xc0] sm:$0xff] }
 0x25f   : > { %1411 = vst [vmem:[#allocation2 + $0x88] sm:$0xff] %v1379_v3  ;;  %v2904_v9 = vadd.f32 %v2903_v7, %v2902_v4  ;;  %v2905_v10 = vpop.f32.mrb[38].mxu1  ;;  %v2778_v11 = vpop.f32.mrb[39].mxu0  ;;  %v521_v7 = vld [vmem:[#allocation2 + $0xc8] sm:$0xff] }
 0x260   : > { %v2779_v13 = vadd.f32 %v2778_v11, %v2777_v8  ;;  %v2906_v14 = vpop.f32.mrb[39].mxu1 }
 0x261   : > { %v1308_v15 = vadd.f32 %v2904_v9, %v2776_v6  ;;  %v2907_v16 = vadd.f32 %v2906_v14, %v2905_v10 }
 0x263   : > { %v1380_v18 = vadd.f32 %v1308_v15, %v514_v12  ;;  %v1311_v19 = vadd.f32 %v2907_v16, %v2779_v13 }
 0x264   : > { %v2780_v20 = vpop.f32.mrb[40].mxu0 }
 0x265   : > { %1412 = vst [vmem:[#allocation2 + $0x90] sm:$0xff] %v1380_v18  ;;  %v1381_v21 = vadd.f32 %v1311_v19, %v515_v17  ;;  %v2908_v22 = vpop.f32.mrb[40].mxu1  ;;  %v2781_v23 = vpop.f32.mrb[41].mxu0 }
 0x266   : > { %v2782_v24 = vadd.f32 %v2781_v23, %v2780_v20  ;;  %v2909_v25 = vpop.f32.mrb[41].mxu1  ;;  %v2783_v26 = vpop.f32.mrb[42].mxu0  ;;  %v522_v20 = vld [vmem:[#allocation2 + $0xd0] sm:$0xff] }
 0x267   : > { %1413 = vst [vmem:[#allocation2 + $0x98] sm:$0xff] %v1381_v21  ;;  %v2910_v27 = vadd.f32 %v2909_v25, %v2908_v22  ;;  %v2911_v28 = vpop.f32.mrb[42].mxu1  ;;  %v2784_v29 = vpop.f32.mrb[43].mxu0  ;;  %v523_v25 = vld [vmem:[#allocation2 + $0xd8] sm:$0xff] }
 0x268   : > { %v2785_v31 = vadd.f32 %v2784_v29, %v2783_v26  ;;  %v2912_v32 = vpop.f32.mrb[43].mxu1 }
 0x269   : > { %v1316_v33 = vadd.f32 %v2910_v27, %v2782_v24  ;;  %v2913_v34 = vadd.f32 %v2912_v32, %v2911_v28 }
 0x26b   : > { %v1382_v36 = vadd.f32 %v1316_v33, %v516_v30  ;;  %v1319_v37 = vadd.f32 %v2913_v34, %v2785_v31 }
 0x26c   : > { %v2786_v38 = vpop.f32.mrb[44].mxu0 }
 0x26d   : > { %1414 = vst [vmem:[#allocation2 + $0xa0] sm:$0xff] %v1382_v36  ;;  %v1383_v39 = vadd.f32 %v1319_v37, %v517_v35  ;;  %v2914_v40 = vpop.f32.mrb[44].mxu1  ;;  %v2787_v41 = vpop.f32.mrb[45].mxu0 }
 0x26e   : > { %v2788_v42 = vadd.f32 %v2787_v41, %v2786_v38  ;;  %v2915_v43 = vpop.f32.mrb[45].mxu1  ;;  %v2789_v44 = vpop.f32.mrb[46].mxu0  ;;  %v524_v38 = vld [vmem:[#allocation2 + $0xe0] sm:$0xff] }
 0x26f   : > { %1415 = vst [vmem:[#allocation2 + $0xa8] sm:$0xff] %v1383_v39  ;;  %v2916_v45 = vadd.f32 %v2915_v43, %v2914_v40  ;;  %v2917_v46 = vpop.f32.mrb[46].mxu1  ;;  %v2790_v47 = vpop.f32.mrb[47].mxu0  ;;  %v525_v43 = vld [vmem:[#allocation2 + $0xe8] sm:$0xff] }
 0x270   : > { %v2791_v49 = vadd.f32 %v2790_v47, %v2789_v44  ;;  %v2918_v50 = vpop.f32.mrb[47].mxu1 }
 0x271   : > { %v1324_v51 = vadd.f32 %v2916_v45, %v2788_v42  ;;  %v2919_v52 = vadd.f32 %v2918_v50, %v2917_v46 }
 0x273   : > { %v1384_v54 = vadd.f32 %v1324_v51, %v518_v48  ;;  %v1327_v55 = vadd.f32 %v2919_v52, %v2791_v49 }
 0x274   : > { %v2792_v56 = vpop.f32.mrb[48].mxu0 }
 0x275   : > { %1416 = vst [vmem:[#allocation2 + $0xb0] sm:$0xff] %v1384_v54  ;;  %v1385_v57 = vadd.f32 %v1327_v55, %v519_v53  ;;  %v2920_v58 = vpop.f32.mrb[48].mxu1  ;;  %v2793_v59 = vpop.f32.mrb[49].mxu0 }
 0x276   : > { %v2794_v60 = vadd.f32 %v2793_v59, %v2792_v56  ;;  %v2921_v61 = vpop.f32.mrb[49].mxu1  ;;  %v2795_v62 = vpop.f32.mrb[50].mxu0  ;;  %v526_v56 = vld [vmem:[#allocation2 + $0xf0] sm:$0xff] }
 0x277   : > { %1417 = vst [vmem:[#allocation2 + $0xb8] sm:$0xff] %v1385_v57  ;;  %v2922_v63 = vadd.f32 %v2921_v61, %v2920_v58  ;;  %v2923_v0 = vpop.f32.mrb[50].mxu1  ;;  %v2796_v1 = vpop.f32.mrb[51].mxu0  ;;  %v527_v61 = vld [vmem:[#allocation2 + $0xf8] sm:$0xff] }
 0x278   : > { %v2797_v3 = vadd.f32 %v2796_v1, %v2795_v62  ;;  %v2924_v4 = vpop.f32.mrb[51].mxu1 }
 0x279   : > { %v1332_v5 = vadd.f32 %v2922_v63, %v2794_v60  ;;  %v2925_v6 = vadd.f32 %v2924_v4, %v2923_v0 }
 0x27b   : > { %v1386_v8 = vadd.f32 %v1332_v5, %v520_v2  ;;  %v1335_v9 = vadd.f32 %v2925_v6, %v2797_v3 }
 0x27c   : > { %v2798_v10 = vpop.f32.mrb[52].mxu0 }
 0x27d   : > { %1418 = vst [vmem:[#allocation2 + $0xc0] sm:$0xff] %v1386_v8  ;;  %v1387_v11 = vadd.f32 %v1335_v9, %v521_v7  ;;  %v2926_v12 = vpop.f32.mrb[52].mxu1  ;;  %v2799_v13 = vpop.f32.mrb[53].mxu0 }
 0x27e   : > { %v2800_v14 = vadd.f32 %v2799_v13, %v2798_v10  ;;  %v2927_v15 = vpop.f32.mrb[53].mxu1  ;;  %v2801_v16 = vpop.f32.mrb[54].mxu0 }
 0x27f   : > { %1419 = vst [vmem:[#allocation2 + $0xc8] sm:$0xff] %v1387_v11  ;;  %v2928_v17 = vadd.f32 %v2927_v15, %v2926_v12  ;;  %v2929_v18 = vpop.f32.mrb[54].mxu1  ;;  %v2802_v19 = vpop.f32.mrb[55].mxu0 }
 0x280   : > { %v2803_v21 = vadd.f32 %v2802_v19, %v2801_v16  ;;  %v2930_v22 = vpop.f32.mrb[55].mxu1 }
 0x281   : > { %v1340_v23 = vadd.f32 %v2928_v17, %v2800_v14  ;;  %v2931_v24 = vadd.f32 %v2930_v22, %v2929_v18 }
 0x283   : > { %v1388_v26 = vadd.f32 %v1340_v23, %v522_v20  ;;  %v1343_v27 = vadd.f32 %v2931_v24, %v2803_v21 }
 0x284   : > { %v2804_v28 = vpop.f32.mrb[56].mxu0 }
 0x285   : > { %1420 = vst [vmem:[#allocation2 + $0xd0] sm:$0xff] %v1388_v26  ;;  %v1389_v29 = vadd.f32 %v1343_v27, %v523_v25  ;;  %v2932_v30 = vpop.f32.mrb[56].mxu1  ;;  %v2805_v31 = vpop.f32.mrb[57].mxu0 }
 0x286   : > { %v2806_v32 = vadd.f32 %v2805_v31, %v2804_v28  ;;  %v2933_v33 = vpop.f32.mrb[57].mxu1  ;;  %v2807_v34 = vpop.f32.mrb[58].mxu0 }
 0x287   : > { %1421 = vst [vmem:[#allocation2 + $0xd8] sm:$0xff] %v1389_v29  ;;  %v2934_v35 = vadd.f32 %v2933_v33, %v2932_v30  ;;  %v2935_v36 = vpop.f32.mrb[58].mxu1  ;;  %v2808_v37 = vpop.f32.mrb[59].mxu0 }
 0x288   : > { %v2809_v39 = vadd.f32 %v2808_v37, %v2807_v34  ;;  %v2936_v40 = vpop.f32.mrb[59].mxu1 }
 0x289   : > { %v1348_v41 = vadd.f32 %v2934_v35, %v2806_v32  ;;  %v2937_v42 = vadd.f32 %v2936_v40, %v2935_v36 }
 0x28b   : > { %v1390_v44 = vadd.f32 %v1348_v41, %v524_v38  ;;  %v1351_v45 = vadd.f32 %v2937_v42, %v2809_v39 }
 0x28c   : > { %v2810_v46 = vpop.f32.mrb[60].mxu0 }
 0x28d   : > { %1422 = vst [vmem:[#allocation2 + $0xe0] sm:$0xff] %v1390_v44  ;;  %v1391_v47 = vadd.f32 %v1351_v45, %v525_v43  ;;  %v2938_v48 = vpop.f32.mrb[60].mxu1  ;;  %v2811_v49 = vpop.f32.mrb[61].mxu0 }
 0x28e   : > { %v2812_v50 = vadd.f32 %v2811_v49, %v2810_v46  ;;  %v2939_v51 = vpop.f32.mrb[61].mxu1  ;;  %v2813_v52 = vpop.f32.mrb[62].mxu0 }
 0x28f   : > { %1423 = vst [vmem:[#allocation2 + $0xe8] sm:$0xff] %v1391_v47  ;;  %v2940_v53 = vadd.f32 %v2939_v51, %v2938_v48  ;;  %v2941_v54 = vpop.f32.mrb[62].mxu1  ;;  %v2814_v55 = vpop.f32.mrb[63].mxu0 }
 0x290   : > { %v2815_v57 = vadd.f32 %v2814_v55, %v2813_v52  ;;  %v2942_v58 = vpop.f32.mrb[63].mxu1 }
 0x291   : > { %v1356_v59 = vadd.f32 %v2940_v53, %v2812_v50  ;;  %v2943_v60 = vadd.f32 %v2942_v58, %v2941_v54  ;;  %1429 = sbr.rel (%p2677_p4) target bundleno = 1083 (0x43b), region = 80 }
 0x293   : > { %v1392_v62 = vadd.f32 %v1356_v59, %v526_v56  ;;  %v1359_v63 = vadd.f32 %v2943_v60, %v2815_v57 }
 0x295   : > { %1424 = vst [vmem:[#allocation2 + $0xf0] sm:$0xff] %v1392_v62  ;;  %v1393_v0 = vadd.f32 %v1359_v63, %v527_v61 }
 0x297   : > { %1425 = vst [vmem:[#allocation2 + $0xf8] sm:$0xff] %v1393_v0 }
 0x298   : > { %v1464_v1 = vld [vmem:[%s4461_s22 + $0x10] sm:$0xff]  ;;  %v1462_v2 = vld [vmem:[%s4461_s22] sm:$0xff]  ;;  %v3984_v3 = vmov 0   ;;  %v1465_v4 = vld [vmem:[%s4461_s22 + $0x18] sm:$0xff] }
 0x299   : > { %3633 = vset.pattern.permute.xlu1 %v3984_v3  ;;  %3632 = vset.pattern.permute.xlu0 %v3984_v3  ;;  %v1463_v5 = vld [vmem:[%s4461_s22 + $0x8] sm:$0xff]  ;;  %v1466_v7 = vld [vmem:[%s4461_s22 + $0x20] sm:$0xff]  ;;  %v1469_v8 = vld [vmem:[%s4461_s22 + $0x38] sm:$0xff] }
 0x29a   : > { %1506 = vperm.xlu1 %3633, %v1464_v1   ;;  %1496 = vperm.xlu0 %3632, %v1462_v2   ;;  %v1467_v6 = vld [vmem:[%s4461_s22 + $0x28] sm:$0xff]  ;;  %v1468_v9 = vld [vmem:[%s4461_s22 + $0x30] sm:$0xff]  ;;  %v1734_v10 = vld [vmem:[#allocation11] sm:$0xff] }
 0x29b   : > { %v1735_v11 = vld [vmem:[#allocation11 + $0x8] sm:$0xff]  ;;  %v1718_v12 = vld [vmem:[#allocation9] sm:$0xff]  ;;  %v1736_v16 = vld [vmem:[#allocation11 + $0x10] sm:$0xff] }
 0x29c   : > { %v1719_v13 = vld [vmem:[#allocation9 + $0x8] sm:$0xff]  ;;  %v3264_v14 = vpack.c.bf16 %v1735_v11, %v1734_v10  ;;  %v1737_v17 = vld [vmem:[#allocation11 + $0x18] sm:$0xff]  ;;  %v1720_v18 = vld [vmem:[#allocation9 + $0x10] sm:$0xff] }
 0x29d   : > { %v3296_v15 = vpack.c.bf16 %v1719_v13, %v1718_v12  ;;  %v3268_v19 = vpack.c.bf16 %v1737_v17, %v1736_v16  ;;  %v1721_v20 = vld [vmem:[#allocation9 + $0x18] sm:$0xff]  ;;  %v1738_v21 = vld [vmem:[#allocation11 + $0x20] sm:$0xff]  ;;  %v1739_v23 = vld [vmem:[#allocation11 + $0x28] sm:$0xff] }
 0x29e   : > { %1511 = vperm.xlu1 %3633, %v1465_v4   ;;  %1501 = vperm.xlu0 %3632, %v1463_v5   ;;  %v3300_v22 = vpack.c.bf16 %v1721_v20, %v1720_v18  ;;  %v1722_v24 = vld [vmem:[#allocation9 + $0x20] sm:$0xff]  ;;  %v1723_v25 = vld [vmem:[#allocation9 + $0x28] sm:$0xff]  ;;  %v3272_v28 = vpack.c.bf16 %v1739_v23, %v1738_v21  ;;  %v1740_v30 = vld [vmem:[#allocation11 + $0x30] sm:$0xff] }
 0x29f   : > { %v1471_v26 = vld [vmem:[%s4461_s22 + $0x48] sm:$0xff]  ;;  %v1470_v27 = vld [vmem:[%s4461_s22 + $0x40] sm:$0xff]  ;;  %3265 = vmatprep.subr.bf16.mxu1 %v3264_v14  ;;  %3297 = vmatprep.subr.bf16.mxu0 %v3296_v15  ;;  %v3304_v29 = vpack.c.bf16 %v1723_v25, %v1722_v24  ;;  %v1741_v31 = vld [vmem:[#allocation11 + $0x38] sm:$0xff] }
 0x2a0   : > { %3267 = vmatpush3.bf16.msra.mxu1 %v3264_v14  ;;  %3299 = vmatpush3.bf16.msra.mxu0 %v3296_v15  ;;  %v1724_v32 = vld [vmem:[#allocation9 + $0x30] sm:$0xff]  ;;  %v1725_v33 = vld [vmem:[#allocation9 + $0x38] sm:$0xff]  ;;  %v3276_v36 = vpack.c.bf16 %v1741_v31, %v1740_v30  ;;  %v1742_v38 = vld [vmem:[#allocation11 + $0x40] sm:$0xff] }
 0x2a1   : > { %3269 = vmatprep.subr.bf16.mxu1 %v3268_v19  ;;  %3301 = vmatprep.subr.bf16.mxu0 %v3300_v22  ;;  %v1473_v34 = vld [vmem:[%s4461_s22 + $0x58] sm:$0xff]  ;;  %v1472_v35 = vld [vmem:[%s4461_s22 + $0x50] sm:$0xff]  ;;  %v3308_v37 = vpack.c.bf16 %v1725_v33, %v1724_v32  ;;  %v1743_v39 = vld [vmem:[#allocation11 + $0x48] sm:$0xff] }
 0x2a2   : > { %1521 = vperm.xlu1 %3633, %v1467_v6   ;;  %1516 = vperm.xlu0 %3632, %v1466_v7   ;;  %v1726_v40 = vld [vmem:[#allocation9 + $0x40] sm:$0xff]  ;;  %v1727_v41 = vld [vmem:[#allocation9 + $0x48] sm:$0xff]  ;;  %v3280_v45 = vpack.c.bf16 %v1743_v39, %v1742_v38  ;;  %v1744_v47 = vld [vmem:[#allocation11 + $0x50] sm:$0xff] }
 0x2a3   : > { %v4608_v42 = vld [vmem:[%s4443_s16] sm:$0xff]  ;;  %v1475_v43 = vld [vmem:[%s4461_s22 + $0x68] sm:$0xff]  ;;  %v3312_v46 = vpack.c.bf16 %v1727_v41, %v1726_v40  ;;  %v1745_v48 = vld [vmem:[#allocation11 + $0x58] sm:$0xff] }
 0x2a4   : > { %3271 = vmatpush3.bf16.msra.mxu1 %v3268_v19  ;;  %3303 = vmatpush3.bf16.msra.mxu0 %v3300_v22  ;;  %v1474_v44 = vld [vmem:[%s4461_s22 + $0x60] sm:$0xff]  ;;  %v1728_v49 = vld [vmem:[#allocation9 + $0x50] sm:$0xff]  ;;  %v1729_v50 = vld [vmem:[#allocation9 + $0x58] sm:$0xff]  ;;  %v3284_v53 = vpack.c.bf16 %v1745_v48, %v1744_v47 }
 0x2a5   : > { %3273 = vmatprep.subr.bf16.mxu1 %v3272_v28  ;;  %3305 = vmatprep.subr.bf16.mxu0 %v3304_v29  ;;  %v1477_v51 = vld [vmem:[%s4461_s22 + $0x78] sm:$0xff]  ;;  %v1476_v52 = vld [vmem:[%s4461_s22 + $0x70] sm:$0xff]  ;;  %v3316_v54 = vpack.c.bf16 %v1729_v50, %v1728_v49  ;;  %v1746_v55 = vld [vmem:[#allocation11 + $0x60] sm:$0xff] }
 0x2a6   : > { %1531 = vperm.xlu1 %3633, %v1469_v8   ;;  %1526 = vperm.xlu0 %3632, %v1468_v9   ;;  %v1747_v56 = vld [vmem:[#allocation11 + $0x68] sm:$0xff]  ;;  %v1730_v57 = vld [vmem:[#allocation9 + $0x60] sm:$0xff]  ;;  %v1748_v63 = vld [vmem:[#allocation11 + $0x70] sm:$0xff] }
 0x2a7   : > { %3072 = vmatprep.mubr.f32.mxu1 %v4608_v42  ;;  %v1731_v58 = vld [vmem:[#allocation9 + $0x68] sm:$0xff]  ;;  %v1478_v60 = vld [vmem:[%s4461_s22 + $0x80] sm:$0xff]  ;;  %v3288_v61 = vpack.c.bf16 %v1747_v56, %v1746_v55  ;;  %v1749_v0 = vld [vmem:[#allocation11 + $0x78] sm:$0xff] }
 0x2a8   : > { %3275 = vmatpush3.bf16.msra.mxu1 %v3272_v28  ;;  %3307 = vmatpush3.bf16.msra.mxu0 %v3304_v29  ;;  %v1479_v59 = vld [vmem:[%s4461_s22 + $0x88] sm:$0xff]  ;;  %v3320_v62 = vpack.c.bf16 %v1731_v58, %v1730_v57  ;;  %v1732_v1 = vld [vmem:[#allocation9 + $0x70] sm:$0xff]  ;;  %v1733_v2 = vld [vmem:[#allocation9 + $0x78] sm:$0xff]  ;;  %v3292_v5 = vpack.c.bf16 %v1749_v0, %v1748_v63 }
 0x2a9   : > { %3277 = vmatprep.subr.bf16.mxu1 %v3276_v36  ;;  %3309 = vmatprep.subr.bf16.mxu0 %v3308_v37  ;;  %v1481_v3 = vld [vmem:[%s4461_s22 + $0x98] sm:$0xff]  ;;  %v1480_v4 = vld [vmem:[%s4461_s22 + $0x90] sm:$0xff]  ;;  %v3324_v6 = vpack.c.bf16 %v1733_v2, %v1732_v1  ;;  %v1483_v7 = vld [vmem:[%s4461_s22 + $0xa8] sm:$0xff] }
 0x2aa   : > { %1541 = vperm.xlu1 %3633, %v1471_v26   ;;  %1536 = vperm.xlu0 %3632, %v1470_v27   ;;  %v1482_v8 = vld [vmem:[%s4461_s22 + $0xa0] sm:$0xff]  ;;  %v1485_v9 = vld [vmem:[%s4461_s22 + $0xb8] sm:$0xff]  ;;  %v1484_v10 = vld [vmem:[%s4461_s22 + $0xb0] sm:$0xff] }
 0x2ab   : > { %v4624_v11 = vld [vmem:[%s4443_s16 + $0x8] sm:$0xff]  ;;  %v4627_v12 = vld [vmem:[%s4443_s16 + $0x10] sm:$0xff]  ;;  %v1486_v14 = vld [vmem:[%s4461_s22 + $0xc0] sm:$0xff] }
 0x2ac   : > { %3279 = vmatpush3.bf16.msra.mxu1 %v3276_v36  ;;  %3311 = vmatpush3.bf16.msra.mxu0 %v3308_v37  ;;  %v1487_v13 = vld [vmem:[%s4461_s22 + $0xc8] sm:$0xff]  ;;  %v4634_v15 = vld [vmem:[%s4443_s16 + $0x18] sm:$0xff]  ;;  %v4637_v16 = vld [vmem:[%s4443_s16 + $0x20] sm:$0xff] }
 0x2ad   : > { %3281 = vmatprep.subr.bf16.mxu1 %v3280_v45  ;;  %3313 = vmatprep.subr.bf16.mxu0 %v3312_v46  ;;  %v1489_v17 = vld [vmem:[%s4461_s22 + $0xd8] sm:$0xff]  ;;  %v1488_v18 = vld [vmem:[%s4461_s22 + $0xd0] sm:$0xff]  ;;  %v4644_v19 = vld [vmem:[%s4443_s16 + $0x28] sm:$0xff] }
 0x2ae   : > { %1551 = vperm.xlu1 %3633, %v1473_v34   ;;  %1546 = vperm.xlu0 %3632, %v1472_v35   ;;  %v4647_v20 = vld [vmem:[%s4443_s16 + $0x30] sm:$0xff]  ;;  %v1491_v21 = vld [vmem:[%s4461_s22 + $0xe8] sm:$0xff]  ;;  %v1490_v22 = vld [vmem:[%s4461_s22 + $0xe0] sm:$0xff] }
 0x2af   : > { %v4654_v23 = vld [vmem:[%s4443_s16 + $0x38] sm:$0xff]  ;;  %v4657_v24 = vld [vmem:[%s4443_s16 + $0x40] sm:$0xff]  ;;  %v1492_v26 = vld [vmem:[%s4461_s22 + $0xf0] sm:$0xff] }
 0x2b0   : > { %3283 = vmatpush3.bf16.msra.mxu1 %v3280_v45  ;;  %3315 = vmatpush3.bf16.msra.mxu0 %v3312_v46  ;;  %v1493_v25 = vld [vmem:[%s4461_s22 + $0xf8] sm:$0xff]  ;;  %v4664_v27 = vld [vmem:[%s4443_s16 + $0x48] sm:$0xff]  ;;  %v4667_v28 = vld [vmem:[%s4443_s16 + $0x50] sm:$0xff] }
 0x2b1   : > { %3285 = vmatprep.subr.bf16.mxu1 %v3284_v53  ;;  %3317 = vmatprep.subr.bf16.mxu0 %v3316_v54  ;;  %v4672_v29 = vld [vmem:[%s4443_s16 + $0x58] sm:$0xff]  ;;  %v4675_v30 = vld [vmem:[%s4443_s16 + $0x60] sm:$0xff]  ;;  %v4680_v31 = vld [vmem:[%s4443_s16 + $0x68] sm:$0xff] }
 0x2b2   : > { %1561 = vperm.xlu1 %3633, %v1475_v43   ;;  %1556 = vperm.xlu0 %3632, %v1474_v44   ;;  %v4683_v32 = vld [vmem:[%s4443_s16 + $0x70] sm:$0xff]  ;;  %v4688_v33 = vld [vmem:[%s4443_s16 + $0x78] sm:$0xff]  ;;  %v4691_v34 = vld [vmem:[%s4443_s16 + $0x80] sm:$0xff] }
 0x2b3   : > { %v4696_v35 = vld [vmem:[%s4443_s16 + $0x88] sm:$0xff]  ;;  %v4699_v36 = vld [vmem:[%s4443_s16 + $0x90] sm:$0xff]  ;;  %v4704_v37 = vld [vmem:[%s4443_s16 + $0x98] sm:$0xff] }
 0x2b4   : > { %3287 = vmatpush3.bf16.msra.mxu1 %v3284_v53  ;;  %3319 = vmatpush3.bf16.msra.mxu0 %v3316_v54  ;;  %v4707_v38 = vld [vmem:[%s4443_s16 + $0xa0] sm:$0xff]  ;;  %v4712_v39 = vld [vmem:[%s4443_s16 + $0xa8] sm:$0xff]  ;;  %v4715_v40 = vld [vmem:[%s4443_s16 + $0xb0] sm:$0xff] }
 0x2b5   : > { %3289 = vmatprep.subr.bf16.mxu1 %v3288_v61  ;;  %3321 = vmatprep.subr.bf16.mxu0 %v3320_v62  ;;  %5121 = vst [vmem:[#allocation31_spill] sm:$0xff] %v4715_v40  ;;  %v4720_v41 = vld [vmem:[%s4443_s16 + $0xb8] sm:$0xff]  ;;  %v4723_v43 = vld [vmem:[%s4443_s16 + $0xc0] sm:$0xff]  ;;  %v4728_v44 = vld [vmem:[%s4443_s16 + $0xc8] sm:$0xff] }
 0x2b6   : > { %1571 = vperm.xlu1 %3633, %v1477_v51   ;;  %1566 = vperm.xlu0 %3632, %v1476_v52   ;;  %5122 = vst [vmem:[#allocation32_spill] sm:$0xff] %v4723_v43  ;;  %5123 = vst [vmem:[#allocation33_spill] sm:$0xff] %v4728_v44  ;;  %v4731_v45 = vld [vmem:[%s4443_s16 + $0xd0] sm:$0xff]  ;;  %v4736_v46 = vld [vmem:[%s4443_s16 + $0xd8] sm:$0xff] }
 0x2b7   : > { %5124 = vst [vmem:[#allocation34_spill] sm:$0xff] %v4731_v45  ;;  %5125 = vst [vmem:[#allocation35_spill] sm:$0xff] %v4736_v46  ;;  %v4739_v47 = vld [vmem:[%s4443_s16 + $0xe0] sm:$0xff]  ;;  %v4744_v48 = vld [vmem:[%s4443_s16 + $0xe8] sm:$0xff] }
 0x2b8   : > { %3291 = vmatpush3.bf16.msra.mxu1 %v3288_v61  ;;  %3323 = vmatpush3.bf16.msra.mxu0 %v3320_v62  ;;  %5126 = vst [vmem:[#allocation36_spill] sm:$0xff] %v4739_v47  ;;  %5127 = vst [vmem:[#allocation37_spill] sm:$0xff] %v4744_v48  ;;  %v4747_v49 = vld [vmem:[%s4443_s16 + $0xf0] sm:$0xff]  ;;  %v4752_v50 = vld [vmem:[%s4443_s16 + $0xf8] sm:$0xff] }
 0x2b9   : > { %3293 = vmatprep.subr.bf16.mxu1 %v3292_v5  ;;  %3325 = vmatprep.subr.bf16.mxu0 %v3324_v6  ;;  %5128 = vst [vmem:[#allocation38_spill] sm:$0xff] %v4747_v49  ;;  %5129 = vst [vmem:[#allocation39_spill] sm:$0xff] %v4752_v50  ;;  %v1430_v51 = vld [vmem:[#allocation2] sm:$0xff]  ;;  %v1432_v54 = vld [vmem:[#allocation2 + $0x10] sm:$0xff] }
 0x2ba   : > { %1581 = vperm.xlu1 %3633, %v1479_v59   ;;  %1576 = vperm.xlu0 %3632, %v1478_v60   ;;  %v1431_v56 = vld [vmem:[#allocation2 + $0x8] sm:$0xff]  ;;  %v1433_v61 = vld [vmem:[#allocation2 + $0x18] sm:$0xff]  ;;  %v1434_v62 = vld [vmem:[#allocation2 + $0x20] sm:$0xff] }
 0x2bc   : > { %3295 = vmatpush3.bf16.msra.mxu1 %v3292_v5  ;;  %3327 = vmatpush3.bf16.msra.mxu0 %v3324_v6 }
 0x2be   : > { %1591 = vperm.xlu1 %3633, %v1481_v3   ;;  %1586 = vperm.xlu0 %3632, %v1480_v4   ;;  %v1435_v3 = vld [vmem:[#allocation2 + $0x28] sm:$0xff]  ;;  %v1436_v4 = vld [vmem:[#allocation2 + $0x30] sm:$0xff] }
 0x2bf   : > { %3073 = vmatmul.mubr.f32.vlgmr.msra.gmra.mrb[0].mxu1 %v4624_v11 }
 0x2c0   : > { %3075 = vmatprep.mubr.f32.mxu1 %v4627_v12 }
 0x2c2   : > { %1601 = vperm.xlu1 %3633, %v1483_v7   ;;  %1596 = vperm.xlu0 %3632, %v1482_v8  }
 0x2c3   : > { %3076 = vmatmul.mubr.f32.gmra.mrb[2].mxu1 %v4634_v15 }
 0x2c4   : > { %3078 = vmatprep.mubr.f32.mxu1 %v4637_v16 }
 0x2c6   : > { %1611 = vperm.xlu1 %3633, %v1485_v9   ;;  %1606 = vperm.xlu0 %3632, %v1484_v10   ;;  %v1437_v9 = vld [vmem:[#allocation2 + $0x38] sm:$0xff]  ;;  %v1438_v10 = vld [vmem:[#allocation2 + $0x40] sm:$0xff] }
 0x2c7   : > { %3079 = vmatmul.mubr.f32.gmra.mrb[4].mxu1 %v4644_v19 }
 0x2c8   : > { %3081 = vmatprep.mubr.f32.mxu1 %v4647_v20 }
 0x2ca   : > { %1621 = vperm.xlu1 %3633, %v1487_v13   ;;  %1616 = vperm.xlu0 %3632, %v1486_v14  }
 0x2cb   : > { %3082 = vmatmul.mubr.f32.gmra.mrb[6].mxu1 %v4654_v23 }
 0x2cc   : > { %3084 = vmatprep.mubr.f32.mxu1 %v4657_v24 }
 0x2ce   : > { %1631 = vperm.xlu1 %3633, %v1489_v17   ;;  %1626 = vperm.xlu0 %3632, %v1488_v18  }
 0x2cf   : > { %3085 = vmatmul.mubr.f32.gmra.mrb[8].mxu1 %v4664_v27 }
 0x2d0   : > { %3087 = vmatprep.mubr.f32.mxu1 %v4667_v28 }
 0x2d2   : > { %1641 = vperm.xlu1 %3633, %v1491_v21   ;;  %1636 = vperm.xlu0 %3632, %v1490_v22   ;;  %v1439_v21 = vld [vmem:[#allocation2 + $0x48] sm:$0xff]  ;;  %v1440_v22 = vld [vmem:[#allocation2 + $0x50] sm:$0xff] }
 0x2d3   : > { %3088 = vmatmul.mubr.f32.gmra.mrb[10].mxu1 %v4672_v29 }
 0x2d4   : > { %3090 = vmatprep.mubr.f32.mxu1 %v4675_v30 }
 0x2d6   : > { %1651 = vperm.xlu1 %3633, %v1493_v25   ;;  %1646 = vperm.xlu0 %3632, %v1492_v26  }
 0x2d7   : > { %3091 = vmatmul.mubr.f32.gmra.mrb[12].mxu1 %v4680_v31 }
 0x2d8   : > { %3093 = vmatprep.mubr.f32.mxu1 %v4683_v32 }
 0x2db   : > { %3094 = vmatmul.mubr.f32.gmra.mrb[14].mxu1 %v4688_v33 }
 0x2dc   : > { %3096 = vmatprep.mubr.f32.mxu1 %v4691_v34 }
 0x2df   : > { %3097 = vmatmul.mubr.f32.gmra.mrb[16].mxu1 %v4696_v35 }
 0x2e0   : > { %3099 = vmatprep.mubr.f32.mxu1 %v4699_v36 }
 0x2e3   : > { %3100 = vmatmul.mubr.f32.gmra.mrb[18].mxu1 %v4704_v37 }
 0x2e4   : > { %3102 = vmatprep.mubr.f32.mxu1 %v4707_v38 }
 0x2e7   : > { %3103 = vmatmul.mubr.f32.gmra.mrb[20].mxu1 %v4712_v39 }
 0x2e8   : > { %3105 = vmatprep.mubr.f32.mxu1 %v4715_v40 }
 0x2eb   : > { %3106 = vmatmul.mubr.f32.gmra.mrb[22].mxu1 %v4720_v41 }
 0x2ec   : > { %3108 = vmatprep.mubr.f32.mxu1 %v4723_v43 }
 0x2ef   : > { %3109 = vmatmul.mubr.f32.gmra.mrb[24].mxu1 %v4728_v44 }
 0x2f0   : > { %3111 = vmatprep.mubr.f32.mxu1 %v4731_v45 }
 0x2f3   : > { %3112 = vmatmul.mubr.f32.gmra.mrb[26].mxu1 %v4736_v46 }
 0x2f4   : > { %3114 = vmatprep.mubr.f32.mxu1 %v4739_v47 }
 0x2f7   : > { %3115 = vmatmul.mubr.f32.gmra.mrb[28].mxu1 %v4744_v48 }
 0x2f8   : > { %3117 = vmatprep.mubr.f32.mxu1 %v4747_v49 }
 0x2fb   : > { %3118 = vmatmul.mubr.f32.gmra.mrb[30].mxu1 %v4752_v50  ;;  %v4807_v50 = vld [vmem:[#allocation12] ss:$0 sm:$0xff] }
 0x319   : > { %v1507_v52 = vpop.permute.xlu1 %1506  ;;  %v1497_v53 = vpop.permute.xlu0 %1496 }
 0x31a   : > { %v1654_v55 = vmul.f32 %v1497_v53, %v1430_v51  ;;  %v1656_v57 = vmul.f32 %v1507_v52, %v1432_v54  ;;  %v1441_v53 = vld [vmem:[#allocation2 + $0x58] sm:$0xff]  ;;  %v1442_v54 = vld [vmem:[#allocation2 + $0x60] sm:$0xff] }
 0x31c   : > { %3152 = vmatprep.mubr.f32.mxu0 %v1654_v55 }
 0x31d   : > { %v1512_v58 = vpop.permute.xlu1 %1511  ;;  %v1502_v59 = vpop.permute.xlu0 %1501 }
 0x31e   : > { %v1655_v60 = vmul.f32 %v1502_v59, %v1431_v56  ;;  %v1657_v1 = vmul.f32 %v1512_v58, %v1433_v61  ;;  %v1443_v59 = vld [vmem:[#allocation2 + $0x68] sm:$0xff] }
 0x320   : > { %3153 = vmatmul.mubr.f32.vlgmr.msra.gmra.mrb[0].mxu0 %v1655_v60  ;;  %v1444_v60 = vld [vmem:[#allocation2 + $0x70] sm:$0xff] }
 0x321   : > { %v1522_v63 = vpop.permute.xlu1 %1521  ;;  %v1517_v0 = vpop.permute.xlu0 %1516  ;;  %3155 = vmatprep.mubr.f32.mxu0 %v1656_v57 }
 0x322   : > { %v1658_v2 = vmul.f32 %v1517_v0, %v1434_v62  ;;  %v1659_v7 = vmul.f32 %v1522_v63, %v1435_v3 }
 0x324   : > { %3156 = vmatmul.mubr.f32.gmra.mrb[2].mxu0 %v1657_v1  ;;  %v1445_v1 = vld [vmem:[#allocation2 + $0x78] sm:$0xff] }
 0x325   : > { %v1532_v5 = vpop.permute.xlu1 %1531  ;;  %v1527_v6 = vpop.permute.xlu0 %1526  ;;  %3158 = vmatprep.mubr.f32.mxu0 %v1658_v2  ;;  %v1446_v2 = vld [vmem:[#allocation2 + $0x80] sm:$0xff] }
 0x326   : > { %v1660_v8 = vmul.f32 %v1527_v6, %v1436_v4  ;;  %v1661_v17 = vmul.f32 %v1532_v5, %v1437_v9 }
 0x328   : > { %3159 = vmatmul.mubr.f32.gmra.mrb[4].mxu0 %v1659_v7  ;;  %v1447_v7 = vld [vmem:[#allocation2 + $0x88] sm:$0xff] }
 0x329   : > { %v1542_v13 = vpop.permute.xlu1 %1541  ;;  %v1537_v14 = vpop.permute.xlu0 %1536  ;;  %3161 = vmatprep.mubr.f32.mxu0 %v1660_v8  ;;  %v1448_v8 = vld [vmem:[#allocation2 + $0x90] sm:$0xff] }
 0x32a   : > { %v1662_v18 = vmul.f32 %v1537_v14, %v1438_v10  ;;  %v1663_v51 = vmul.f32 %v1542_v13, %v1439_v21 }
 0x32c   : > { %3162 = vmatmul.mubr.f32.gmra.mrb[6].mxu0 %v1661_v17  ;;  %v1449_v17 = vld [vmem:[#allocation2 + $0x98] sm:$0xff] }
 0x32d   : > { %v1552_v25 = vpop.permute.xlu1 %1551  ;;  %v1547_v26 = vpop.permute.xlu0 %1546  ;;  %3164 = vmatprep.mubr.f32.mxu0 %v1662_v18  ;;  %v1450_v18 = vld [vmem:[#allocation2 + $0xa0] sm:$0xff] }
 0x32e   : > { %v1664_v52 = vmul.f32 %v1547_v26, %v1440_v22  ;;  %v1665_v57 = vmul.f32 %v1552_v25, %v1441_v53 }
 0x330   : > { %3165 = vmatmul.mubr.f32.gmra.mrb[8].mxu0 %v1663_v51  ;;  %v1451_v51 = vld [vmem:[#allocation2 + $0xa8] sm:$0xff] }
 0x331   : > { %v1562_v55 = vpop.permute.xlu1 %1561  ;;  %v1557_v56 = vpop.permute.xlu0 %1556  ;;  %3167 = vmatprep.mubr.f32.mxu0 %v1664_v52  ;;  %v1452_v52 = vld [vmem:[#allocation2 + $0xb0] sm:$0xff] }
 0x332   : > { %v1666_v58 = vmul.f32 %v1557_v56, %v1442_v54  ;;  %v1667_v63 = vmul.f32 %v1562_v55, %v1443_v59 }
 0x334   : > { %3168 = vmatmul.mubr.f32.gmra.mrb[10].mxu0 %v1665_v57  ;;  %v1453_v57 = vld [vmem:[#allocation2 + $0xb8] sm:$0xff] }
 0x335   : > { %v1572_v61 = vpop.permute.xlu1 %1571  ;;  %v1567_v62 = vpop.permute.xlu0 %1566  ;;  %3170 = vmatprep.mubr.f32.mxu0 %v1666_v58  ;;  %v1454_v58 = vld [vmem:[#allocation2 + $0xc0] sm:$0xff] }
 0x336   : > { %v1668_v0 = vmul.f32 %v1567_v62, %v1444_v60  ;;  %v1669_v5 = vmul.f32 %v1572_v61, %v1445_v1 }
 0x338   : > { %3171 = vmatmul.mubr.f32.gmra.mrb[12].mxu0 %v1667_v63  ;;  %v1455_v63 = vld [vmem:[#allocation2 + $0xc8] sm:$0xff] }
 0x339   : > { %v1582_v3 = vpop.permute.xlu1 %1581  ;;  %v1577_v4 = vpop.permute.xlu0 %1576  ;;  %3173 = vmatprep.mubr.f32.mxu0 %v1668_v0  ;;  %v1456_v0 = vld [vmem:[#allocation2 + $0xd0] sm:$0xff] }
 0x33a   : > { %v1670_v6 = vmul.f32 %v1577_v4, %v1446_v2  ;;  %v1671_v13 = vmul.f32 %v1582_v3, %v1447_v7 }
 0x33c   : > { %3174 = vmatmul.mubr.f32.gmra.mrb[14].mxu0 %v1669_v5  ;;  %v1457_v5 = vld [vmem:[#allocation2 + $0xd8] sm:$0xff] }
 0x33d   : > { %v1592_v9 = vpop.permute.xlu1 %1591  ;;  %v1587_v10 = vpop.permute.xlu0 %1586  ;;  %3176 = vmatprep.mubr.f32.mxu0 %v1670_v6  ;;  %v1458_v6 = vld [vmem:[#allocation2 + $0xe0] sm:$0xff] }
 0x33e   : > { %v1672_v14 = vmul.f32 %v1587_v10, %v1448_v8  ;;  %v1673_v25 = vmul.f32 %v1592_v9, %v1449_v17 }
 0x340   : > { %3177 = vmatmul.mubr.f32.gmra.mrb[16].mxu0 %v1671_v13  ;;  %v1459_v13 = vld [vmem:[#allocation2 + $0xe8] sm:$0xff] }
 0x341   : > { %v1602_v21 = vpop.permute.xlu1 %1601  ;;  %v1597_v22 = vpop.permute.xlu0 %1596  ;;  %3179 = vmatprep.mubr.f32.mxu0 %v1672_v14  ;;  %v1460_v14 = vld [vmem:[#allocation2 + $0xf0] sm:$0xff] }
 0x342   : > { %v1674_v26 = vmul.f32 %v1597_v22, %v1450_v18  ;;  %v1675_v55 = vmul.f32 %v1602_v21, %v1451_v51 }
 0x344   : > { %3180 = vmatmul.mubr.f32.gmra.mrb[18].mxu0 %v1673_v25  ;;  %v1461_v25 = vld [vmem:[#allocation2 + $0xf8] sm:$0xff] }
 0x345   : > { %v1612_v53 = vpop.permute.xlu1 %1611  ;;  %v1607_v54 = vpop.permute.xlu0 %1606  ;;  %3182 = vmatprep.mubr.f32.mxu0 %v1674_v26 }
 0x346   : > { %v1676_v56 = vmul.f32 %v1607_v54, %v1452_v52  ;;  %v1677_v61 = vmul.f32 %v1612_v53, %v1453_v57 }
 0x348   : > { %3183 = vmatmul.mubr.f32.gmra.mrb[20].mxu0 %v1675_v55 }
 0x349   : > { %v1622_v59 = vpop.permute.xlu1 %1621  ;;  %v1617_v60 = vpop.permute.xlu0 %1616  ;;  %3185 = vmatprep.mubr.f32.mxu0 %v1676_v56 }
 0x34a   : > { %v1678_v62 = vmul.f32 %v1617_v60, %v1454_v58  ;;  %v1679_v3 = vmul.f32 %v1622_v59, %v1455_v63 }
 0x34c   : > { %3186 = vmatmul.mubr.f32.gmra.mrb[22].mxu0 %v1677_v61 }
 0x34d   : > { %v1632_v1 = vpop.permute.xlu1 %1631  ;;  %v1627_v2 = vpop.permute.xlu0 %1626  ;;  %3188 = vmatprep.mubr.f32.mxu0 %v1678_v62 }
 0x34e   : > { %v1680_v4 = vmul.f32 %v1627_v2, %v1456_v0  ;;  %v1681_v9 = vmul.f32 %v1632_v1, %v1457_v5 }
 0x350   : > { %3189 = vmatmul.mubr.f32.gmra.mrb[24].mxu0 %v1679_v3 }
 0x351   : > { %v1642_v7 = vpop.permute.xlu1 %1641  ;;  %v1637_v8 = vpop.permute.xlu0 %1636  ;;  %3191 = vmatprep.mubr.f32.mxu0 %v1680_v4 }
 0x352   : > { %v1682_v10 = vmul.f32 %v1637_v8, %v1458_v6  ;;  %v1683_v18 = vmul.f32 %v1642_v7, %v1459_v13 }
 0x354   : > { %3192 = vmatmul.mubr.f32.gmra.mrb[26].mxu0 %v1681_v9 }
 0x355   : > { %v1647_v17 = vpop.permute.xlu0 %1646  ;;  %3194 = vmatprep.mubr.f32.mxu0 %v1682_v10  ;;  %v1652_v22 = vpop.permute.xlu1 %1651 }
 0x356   : > { %v1684_v21 = vmul.f32 %v1647_v17, %v1460_v14  ;;  %v1685_v26 = vmul.f32 %v1652_v22, %v1461_v25 }
 0x358   : > { %3195 = vmatmul.mubr.f32.gmra.mrb[28].mxu0 %v1683_v18 }
 0x359   : > { %3197 = vmatprep.mubr.f32.mxu0 %v1684_v21 }
 0x35c   : > { %3198 = vmatmul.mubr.f32.gmra.mrb[30].mxu0 %v1685_v26 }
 0x392   : > { %v3074_v51 = vpop.f32.mrb[0].mxu1 }
 0x393   : > { %v1816_v52 = vpop.f32.mrb[1].mxu1 }
 0x396   : > { %v3077_v53 = vpop.f32.mrb[2].mxu1 }
 0x397   : > { %v1826_v54 = vpop.f32.mrb[3].mxu1 }
 0x39a   : > { %v3080_v55 = vpop.f32.mrb[4].mxu1 }
 0x39b   : > { %v1836_v56 = vpop.f32.mrb[5].mxu1 }
 0x39e   : > { %v4755_v57 = vpop.f32.mrb[6].mxu1 }
 0x39f   : > { %v4757_v58 = vpop.f32.mrb[7].mxu1 }
 0x3a2   : > { %v4759_v59 = vpop.f32.mrb[8].mxu1 }
 0x3a3   : > { %v4761_v60 = vpop.f32.mrb[9].mxu1 }
 0x3a6   : > { %v4763_v61 = vpop.f32.mrb[10].mxu1 }
 0x3a7   : > { %v4765_v62 = vpop.f32.mrb[11].mxu1 }
 0x3aa   : > { %v4767_v63 = vpop.f32.mrb[12].mxu1 }
 0x3ab   : > { %v4769_v0 = vpop.f32.mrb[13].mxu1 }
 0x3ae   : > { %v4771_v1 = vpop.f32.mrb[14].mxu1 }
 0x3af   : > { %v4773_v2 = vpop.f32.mrb[15].mxu1 }
 0x3b2   : > { %v4775_v3 = vpop.f32.mrb[16].mxu1 }
 0x3b3   : > { %v4777_v4 = vpop.f32.mrb[17].mxu1 }
 0x3b6   : > { %v4779_v5 = vpop.f32.mrb[18].mxu1 }
 0x3b7   : > { %v4781_v6 = vpop.f32.mrb[19].mxu1 }
 0x3ba   : > { %v4783_v7 = vpop.f32.mrb[20].mxu1 }
 0x3bb   : > { %v4785_v8 = vpop.f32.mrb[21].mxu1 }
 0x3be   : > { %v4787_v9 = vpop.f32.mrb[22].mxu1 }
 0x3bf   : > { %v4789_v10 = vpop.f32.mrb[23].mxu1 }
 0x3c2   : > { %v4791_v13 = vpop.f32.mrb[24].mxu1 }
 0x3c3   : > { %v4793_v14 = vpop.f32.mrb[25].mxu1 }
 0x3c6   : > { %v4795_v17 = vpop.f32.mrb[26].mxu1 }
 0x3c7   : > { %5130 = vst [vmem:[#allocation40_spill] sm:$0xff] %v4795_v17  ;;  %v4797_v18 = vpop.f32.mrb[27].mxu1 }
 0x3c8   : > { %5131 = vst [vmem:[#allocation41_spill] sm:$0xff] %v4797_v18 }
 0x3ca   : > { %v4799_v21 = vpop.f32.mrb[28].mxu1 }
 0x3cb   : > { %5132 = vst [vmem:[#allocation42_spill] sm:$0xff] %v4799_v21  ;;  %v4801_v22 = vpop.f32.mrb[29].mxu1 }
 0x3cc   : > { %5133 = vst [vmem:[#allocation43_spill] sm:$0xff] %v4801_v22 }
 0x3ce   : > { %v4803_v25 = vpop.f32.mrb[30].mxu1 }
 0x3cf   : > { %5134 = vst [vmem:[#allocation44_spill] sm:$0xff] %v4803_v25  ;;  %v4805_v26 = vpop.f32.mrb[31].mxu1 }
 0x3d0   : > { %5135 = vst [vmem:[#allocation45_spill] sm:$0xff] %v4805_v26 }
 0x3f3   : > { %v3154_v49 = vpop.f32.mrb[0].mxu0 }
 0x3f4   : > { %v2047_v47 = vadd.f32 %v3154_v49, %v3074_v51  ;;  %v2041_v48 = vpop.f32.mrb[1].mxu0 }
 0x3f5   : > { %v2042_v45 = vadd.f32 %v2041_v48, %v1816_v52 }
 0x3f6   : > { %v2208_v46 = vadd.f32 %v4807_v50, %v2047_v47 }
 0x3f7   : > { %v2207_v43 = vadd.f32 %v4807_v50, %v2042_v45  ;;  %v3157_v44 = vpop.f32.mrb[2].mxu0 }
 0x3f8   : > { %vm2240_vm0 = vcmp.ge.f32.partialorder %v2208_v46, 0.0  ;;  %v2272_v18 = vmul.f32 0.01, %v2208_v46  ;;  %v2057_v21 = vadd.f32 %v3157_v44, %v3077_v53  ;;  %v2051_v22 = vpop.f32.mrb[3].mxu0 }
 0x3f9   : > { %vm2239_vm1 = vcmp.ge.f32.partialorder %v2207_v43, 0.0  ;;  %v2271_v25 = vmul.f32 0.01, %v2207_v43  ;;  %v2052_v17 = vadd.f32 %v2051_v22, %v1826_v54 }
 0x3fa   : > { %v2304_v26 = vsel %vm2240_vm0, %v2208_v46, %v2272_v18  ;;  %v2210_v40 = vadd.f32 %v4807_v50, %v2057_v21 }
 0x3fb   : > { %v2336_v49 = vadd.f32 %v2304_v26, %v4624_v11  ;;  %v2303_v48 = vsel %vm2239_vm1, %v2207_v43, %v2271_v25  ;;  %v2209_v47 = vadd.f32 %v4807_v50, %v2052_v17  ;;  %v3160_v51 = vpop.f32.mrb[4].mxu0 }
 0x3fc   : > { %v2335_v45 = vadd.f32 %v2303_v48, %v4608_v42  ;;  %vm2242_vm2 = vcmp.ge.f32.partialorder %v2210_v40, 0.0  ;;  %v2274_v52 = vmul.f32 0.01, %v2210_v40  ;;  %v2067_v44 = vadd.f32 %v3160_v51, %v3080_v55  ;;  %v2061_v53 = vpop.f32.mrb[5].mxu0 }
 0x3fd   : > { %2368 = vst [vmem:[%s4463_s7 + $0x8] sm:$0xff] %v2336_v49  ;;  %vm2241_vm3 = vcmp.ge.f32.partialorder %v2209_v47, 0.0  ;;  %v2273_v54 = vmul.f32 0.01, %v2209_v47  ;;  %v2062_v22 = vadd.f32 %v2061_v53, %v1836_v56 }
 0x3fe   : > { %2367 = vst [vmem:[%s4463_s7] sm:$0xff] %v2335_v45  ;;  %v2306_v46 = vsel %vm2242_vm2, %v2210_v40, %v2274_v52  ;;  %v2212_v11 = vadd.f32 %v4807_v50, %v2067_v44 }
 0x3ff   : > { %v2338_v43 = vadd.f32 %v2306_v46, %v4634_v15  ;;  %v2305_v17 = vsel %vm2241_vm3, %v2209_v47, %v2273_v54  ;;  %v2211_v18 = vadd.f32 %v4807_v50, %v2062_v22  ;;  %v3163_v42 = vpop.f32.mrb[6].mxu0 }
 0x400   : > { %v2337_v21 = vadd.f32 %v2305_v17, %v4627_v12  ;;  %vm2244_vm4 = vcmp.ge.f32.partialorder %v2212_v11, 0.0  ;;  %v2276_v55 = vmul.f32 0.01, %v2212_v11  ;;  %v2077_v25 = vadd.f32 %v3163_v42, %v4755_v57  ;;  %v2071_v26 = vpop.f32.mrb[7].mxu0 }
 0x401   : > { %2370 = vst [vmem:[%s4463_s7 + $0x18] sm:$0xff] %v2338_v43  ;;  %vm2243_vm5 = vcmp.ge.f32.partialorder %v2211_v18, 0.0  ;;  %v2275_v56 = vmul.f32 0.01, %v2211_v18  ;;  %v2072_v40 = vadd.f32 %v2071_v26, %v4757_v58 }
 0x402   : > { %2369 = vst [vmem:[%s4463_s7 + $0x10] sm:$0xff] %v2337_v21  ;;  %v2308_v15 = vsel %vm2244_vm4, %v2212_v11, %v2276_v55  ;;  %v2214_v49 = vadd.f32 %v4807_v50, %v2077_v25 }
 0x403   : > { %v2340_v48 = vadd.f32 %v2308_v15, %v4644_v19  ;;  %v2307_v47 = vsel %vm2243_vm5, %v2211_v18, %v2275_v56  ;;  %v2213_v12 = vadd.f32 %v4807_v50, %v2072_v40  ;;  %v3166_v51 = vpop.f32.mrb[8].mxu0 }
 0x404   : > { %v2339_v57 = vadd.f32 %v2307_v47, %v4637_v16  ;;  %vm2246_vm6 = vcmp.ge.f32.partialorder %v2214_v49, 0.0  ;;  %v2278_v45 = vmul.f32 0.01, %v2214_v49  ;;  %v2087_v52 = vadd.f32 %v3166_v51, %v4759_v59  ;;  %v2081_v44 = vpop.f32.mrb[9].mxu0 }
 0x405   : > { %2372 = vst [vmem:[%s4463_s7 + $0x28] sm:$0xff] %v2340_v48  ;;  %vm2245_vm7 = vcmp.ge.f32.partialorder %v2213_v12, 0.0  ;;  %v2277_v58 = vmul.f32 0.01, %v2213_v12  ;;  %v2082_v53 = vadd.f32 %v2081_v44, %v4761_v60 }
 0x406   : > { %2371 = vst [vmem:[%s4463_s7 + $0x20] sm:$0xff] %v2339_v57  ;;  %v2310_v19 = vsel %vm2246_vm6, %v2214_v49, %v2278_v45  ;;  %v2216_v54 = vadd.f32 %v4807_v50, %v2087_v52 }
 0x407   : > { %v2342_v22 = vadd.f32 %v2310_v19, %v4654_v23  ;;  %v2309_v46 = vsel %vm2245_vm7, %v2213_v12, %v2277_v58  ;;  %v2215_v16 = vadd.f32 %v4807_v50, %v2082_v53  ;;  %v3169_v11 = vpop.f32.mrb[10].mxu0 }
 0x408   : > { %v2341_v59 = vadd.f32 %v2309_v46, %v4647_v20  ;;  %vm2248_vm8 = vcmp.ge.f32.partialorder %v2216_v54, 0.0  ;;  %v2280_v43 = vmul.f32 0.01, %v2216_v54  ;;  %v2097_v17 = vadd.f32 %v3169_v11, %v4763_v61  ;;  %v2091_v18 = vpop.f32.mrb[11].mxu0 }
 0x409   : > { %2374 = vst [vmem:[%s4463_s7 + $0x38] sm:$0xff] %v2342_v22  ;;  %vm2247_vm9 = vcmp.ge.f32.partialorder %v2215_v16, 0.0  ;;  %v2279_v60 = vmul.f32 0.01, %v2215_v16  ;;  %v2092_v42 = vadd.f32 %v2091_v18, %v4765_v62 }
 0x40a   : > { %2373 = vst [vmem:[%s4463_s7 + $0x30] sm:$0xff] %v2341_v59  ;;  %v2312_v23 = vsel %vm2248_vm8, %v2216_v54, %v2280_v43  ;;  %v2218_v21 = vadd.f32 %v4807_v50, %v2097_v17 }
 0x40b   : > { %v2344_v55 = vadd.f32 %v2312_v23, %v4664_v27  ;;  %v2311_v25 = vsel %vm2247_vm9, %v2215_v16, %v2279_v60  ;;  %v2217_v20 = vadd.f32 %v4807_v50, %v2092_v42  ;;  %v3172_v26 = vpop.f32.mrb[12].mxu0 }
 0x40c   : > { %v2343_v61 = vadd.f32 %v2311_v25, %v4657_v24  ;;  %vm2250_vm10 = vcmp.ge.f32.partialorder %v2218_v21, 0.0  ;;  %v2282_v56 = vmul.f32 0.01, %v2218_v21  ;;  %v2107_v40 = vadd.f32 %v3172_v26, %v4767_v63  ;;  %v2101_v15 = vpop.f32.mrb[13].mxu0 }
 0x40d   : > { %2376 = vst [vmem:[%s4463_s7 + $0x48] sm:$0xff] %v2344_v55  ;;  %vm2249_vm11 = vcmp.ge.f32.partialorder %v2217_v20, 0.0  ;;  %v2281_v62 = vmul.f32 0.01, %v2217_v20  ;;  %v2102_v49 = vadd.f32 %v2101_v15, %v4769_v0 }
 0x40e   : > { %2375 = vst [vmem:[%s4463_s7 + $0x40] sm:$0xff] %v2343_v61  ;;  %v2314_v27 = vsel %vm2250_vm10, %v2218_v21, %v2282_v56  ;;  %v2220_v48 = vadd.f32 %v4807_v50, %v2107_v40 }
 0x40f   : > { %v2346_v47 = vadd.f32 %v2314_v27, %v4672_v29  ;;  %v2313_v12 = vsel %vm2249_vm11, %v2217_v20, %v2281_v62  ;;  %v2219_v24 = vadd.f32 %v4807_v50, %v2102_v49  ;;  %v3175_v51 = vpop.f32.mrb[14].mxu0 }
 0x410   : > { %v2345_v63 = vadd.f32 %v2313_v12, %v4667_v28  ;;  %vm2252_vm12 = vcmp.ge.f32.partialorder %v2220_v48, 0.0  ;;  %v2284_v57 = vmul.f32 0.01, %v2220_v48  ;;  %v2117_v45 = vadd.f32 %v3175_v51, %v4771_v1  ;;  %v2111_v52 = vpop.f32.mrb[15].mxu0 }
 0x411   : > { %2378 = vst [vmem:[%s4463_s7 + $0x58] sm:$0xff] %v2346_v47  ;;  %vm2251_vm13 = vcmp.ge.f32.partialorder %v2219_v24, 0.0  ;;  %v2283_v0 = vmul.f32 0.01, %v2219_v24  ;;  %v2112_v44 = vadd.f32 %v2111_v52, %v4773_v2 }
 0x412   : > { %2377 = vst [vmem:[%s4463_s7 + $0x50] sm:$0xff] %v2345_v63  ;;  %v2316_v29 = vsel %vm2252_vm12, %v2220_v48, %v2284_v57  ;;  %v2222_v58 = vadd.f32 %v4807_v50, %v2117_v45 }
 0x413   : > { %v2348_v53 = vadd.f32 %v2316_v29, %v4680_v31  ;;  %v2315_v19 = vsel %vm2251_vm13, %v2219_v24, %v2283_v0  ;;  %v2221_v28 = vadd.f32 %v4807_v50, %v2112_v44  ;;  %v3178_v54 = vpop.f32.mrb[16].mxu0 }
 0x414   : > { %v2347_v1 = vadd.f32 %v2315_v19, %v4675_v30  ;;  %vm2254_vm14 = vcmp.ge.f32.partialorder %v2222_v58, 0.0  ;;  %v2286_v22 = vmul.f32 0.01, %v2222_v58  ;;  %v2127_v46 = vadd.f32 %v3178_v54, %v4775_v3  ;;  %v2121_v16 = vpop.f32.mrb[17].mxu0 }
 0x415   : > { %2380 = vst [vmem:[%s4463_s7 + $0x68] sm:$0xff] %v2348_v53  ;;  %vm2253_vm15 = vcmp.ge.f32.partialorder %v2221_v28, 0.0  ;;  %v2285_v2 = vmul.f32 0.01, %v2221_v28  ;;  %v2122_v11 = vadd.f32 %v2121_v16, %v4777_v4 }
 0x416   : > { %2379 = vst [vmem:[%s4463_s7 + $0x60] sm:$0xff] %v2347_v1  ;;  %v2318_v31 = vsel %vm2254_vm14, %v2222_v58, %v2286_v22  ;;  %v2224_v59 = vadd.f32 %v4807_v50, %v2127_v46  ;;  %v5136_v1 = vld [vmem:[#allocation31_spill] sm:$0xff]  ;;  %v5137_v46 = vld [vmem:[#allocation40_spill] sm:$0xff] }
 0x417   : > { %v2350_v43 = vadd.f32 %v2318_v31, %v4688_v33  ;;  %v2317_v17 = vsel %vm2253_vm15, %v2221_v28, %v2285_v2  ;;  %v2223_v30 = vadd.f32 %v4807_v50, %v2122_v11  ;;  %v3181_v18 = vpop.f32.mrb[18].mxu0  ;;  %v5138_v11 = vld [vmem:[#allocation41_spill] sm:$0xff] }
 0x418   : > { %v2349_v3 = vadd.f32 %v2317_v17, %v4683_v32  ;;  %vm2256_vm0 = vcmp.ge.f32.partialorder %v2224_v59, 0.0  ;;  %v2288_v60 = vmul.f32 0.01, %v2224_v59  ;;  %v2137_v42 = vadd.f32 %v3181_v18, %v4779_v5  ;;  %v2131_v23 = vpop.f32.mrb[19].mxu0 }
 0x419   : > { %2382 = vst [vmem:[%s4463_s7 + $0x78] sm:$0xff] %v2350_v43  ;;  %vm2255_vm1 = vcmp.ge.f32.partialorder %v2223_v30, 0.0  ;;  %v2287_v4 = vmul.f32 0.01, %v2223_v30  ;;  %v2132_v21 = vadd.f32 %v2131_v23, %v4781_v6  ;;  %v5139_v43 = vld [vmem:[#allocation33_spill] sm:$0xff] }
 0x41a   : > { %2381 = vst [vmem:[%s4463_s7 + $0x70] sm:$0xff] %v2349_v3  ;;  %v2320_v33 = vsel %vm2256_vm0, %v2224_v59, %v2288_v60  ;;  %v2226_v55 = vadd.f32 %v4807_v50, %v2137_v42  ;;  %v5140_v60 = vld [vmem:[#allocation32_spill] sm:$0xff] }
 0x41b   : > { %v2352_v25 = vadd.f32 %v2320_v33, %v4696_v35  ;;  %v2319_v20 = vsel %vm2255_vm1, %v2223_v30, %v2287_v4  ;;  %v2225_v32 = vadd.f32 %v4807_v50, %v2132_v21  ;;  %v3184_v26 = vpop.f32.mrb[20].mxu0  ;;  %v5141_v4 = vld [vmem:[#allocation42_spill] sm:$0xff] }
 0x41c   : > { %v2351_v5 = vadd.f32 %v2319_v20, %v4691_v34  ;;  %vm2258_vm2 = vcmp.ge.f32.partialorder %v2226_v55, 0.0  ;;  %v2290_v61 = vmul.f32 0.01, %v2226_v55  ;;  %v2147_v56 = vadd.f32 %v3184_v26, %v4783_v7  ;;  %v2141_v40 = vpop.f32.mrb[21].mxu0 }
 0x41d   : > { %2384 = vst [vmem:[%s4463_s7 + $0x88] sm:$0xff] %v2352_v25  ;;  %vm2257_vm3 = vcmp.ge.f32.partialorder %v2225_v32, 0.0  ;;  %v2289_v6 = vmul.f32 0.01, %v2225_v32  ;;  %v2142_v15 = vadd.f32 %v2141_v40, %v4785_v8  ;;  %v5142_v25 = vld [vmem:[#allocation43_spill] sm:$0xff] }
 0x41e   : > { %2383 = vst [vmem:[%s4463_s7 + $0x80] sm:$0xff] %v2351_v5  ;;  %v2322_v35 = vsel %vm2258_vm2, %v2226_v55, %v2290_v61  ;;  %v2228_v62 = vadd.f32 %v4807_v50, %v2147_v56  ;;  %v5143_v5 = vld [vmem:[#allocation35_spill] sm:$0xff] }
 0x41f   : > { %v2354_v49 = vadd.f32 %v2322_v35, %v4704_v37  ;;  %v2321_v27 = vsel %vm2257_vm3, %v2225_v32, %v2289_v6  ;;  %v2227_v34 = vadd.f32 %v4807_v50, %v2142_v15  ;;  %v3187_v48 = vpop.f32.mrb[22].mxu0  ;;  %v5144_v15 = vld [vmem:[#allocation34_spill] sm:$0xff] }
 0x420   : > { %v2353_v7 = vadd.f32 %v2321_v27, %v4699_v36  ;;  %vm2260_vm4 = vcmp.ge.f32.partialorder %v2228_v62, 0.0  ;;  %v2292_v47 = vmul.f32 0.01, %v2228_v62  ;;  %v2157_v12 = vadd.f32 %v3187_v48, %v4787_v9  ;;  %v2151_v24 = vpop.f32.mrb[23].mxu0 }
 0x421   : > { %2386 = vst [vmem:[%s4463_s7 + $0x98] sm:$0xff] %v2354_v49  ;;  %vm2259_vm5 = vcmp.ge.f32.partialorder %v2227_v34, 0.0  ;;  %v2291_v8 = vmul.f32 0.01, %v2227_v34  ;;  %v2152_v51 = vadd.f32 %v2151_v24, %v4789_v10  ;;  %v5145_v49 = vld [vmem:[#allocation44_spill] sm:$0xff] }
 0x422   : > { %2385 = vst [vmem:[%s4463_s7 + $0x90] sm:$0xff] %v2353_v7  ;;  %v2324_v37 = vsel %vm2260_vm4, %v2228_v62, %v2292_v47  ;;  %v2230_v63 = vadd.f32 %v4807_v50, %v2157_v12  ;;  %v5146_v7 = vld [vmem:[#allocation45_spill] sm:$0xff] }
 0x423   : > { %v2356_v57 = vadd.f32 %v2324_v37, %v4712_v39  ;;  %v2323_v45 = vsel %vm2259_vm5, %v2227_v34, %v2291_v8  ;;  %v2229_v36 = vadd.f32 %v4807_v50, %v2152_v51  ;;  %v3190_v52 = vpop.f32.mrb[24].mxu0  ;;  %v5147_v8 = vld [vmem:[#allocation37_spill] sm:$0xff] }
 0x424   : > { %v2355_v9 = vadd.f32 %v2323_v45, %v4707_v38  ;;  %vm2262_vm6 = vcmp.ge.f32.partialorder %v2230_v63, 0.0  ;;  %v2294_v0 = vmul.f32 0.01, %v2230_v63  ;;  %v2167_v44 = vadd.f32 %v3190_v52, %v4791_v13  ;;  %v2161_v29 = vpop.f32.mrb[25].mxu0 }
 0x425   : > { %2388 = vst [vmem:[%s4463_s7 + $0xa8] sm:$0xff] %v2356_v57  ;;  %vm2261_vm7 = vcmp.ge.f32.partialorder %v2229_v36, 0.0  ;;  %v2293_v10 = vmul.f32 0.01, %v2229_v36  ;;  %v2162_v58 = vadd.f32 %v2161_v29, %v4793_v14  ;;  %v5148_v57 = vld [vmem:[#allocation36_spill] sm:$0xff] }
 0x426   : > { %2387 = vst [vmem:[%s4463_s7 + $0xa0] sm:$0xff] %v2355_v9  ;;  %v2326_v39 = vsel %vm2262_vm6, %v2230_v63, %v2294_v0  ;;  %v2232_v53 = vadd.f32 %v4807_v50, %v2167_v44  ;;  %v5149_v0 = vld [vmem:[#allocation39_spill] sm:$0xff] }
 0x427   : > { %v2358_v19 = vadd.f32 %v2326_v39, %v4720_v41  ;;  %v2325_v28 = vsel %vm2261_vm7, %v2229_v36, %v2293_v10  ;;  %v2231_v38 = vadd.f32 %v4807_v50, %v2162_v58  ;;  %v3193_v54 = vpop.f32.mrb[26].mxu0  ;;  %v5150_v10 = vld [vmem:[#allocation38_spill] sm:$0xff] }
 0x428   : > { %v2357_v13 = vadd.f32 %v2325_v28, %v5136_v1  ;;  %vm2264_vm8 = vcmp.ge.f32.partialorder %v2232_v53, 0.0  ;;  %v2296_v22 = vmul.f32 0.01, %v2232_v53  ;;  %v2177_v16 = vadd.f32 %v3193_v54, %v5137_v46  ;;  %v2171_v2 = vpop.f32.mrb[27].mxu0 }
 0x429   : > { %2390 = vst [vmem:[%s4463_s7 + $0xb8] sm:$0xff] %v2358_v19  ;;  %vm2263_vm9 = vcmp.ge.f32.partialorder %v2231_v38, 0.0  ;;  %v2295_v14 = vmul.f32 0.01, %v2231_v38  ;;  %v2172_v31 = vadd.f32 %v2171_v2, %v5138_v11 }
 0x42a   : > { %2389 = vst [vmem:[%s4463_s7 + $0xb0] sm:$0xff] %v2357_v13  ;;  %v2328_v41 = vsel %vm2264_vm8, %v2232_v53, %v2296_v22  ;;  %v2234_v59 = vadd.f32 %v4807_v50, %v2177_v16 }
 0x42b   : > { %v2360_v17 = vadd.f32 %v2328_v41, %v5139_v43  ;;  %v2327_v30 = vsel %vm2263_vm9, %v2231_v38, %v2295_v14  ;;  %v2233_v18 = vadd.f32 %v4807_v50, %v2172_v31  ;;  %v3196_v3 = vpop.f32.mrb[28].mxu0 }
 0x42c   : > { %v2359_v42 = vadd.f32 %v2327_v30, %v5140_v60  ;;  %vm2266_vm10 = vcmp.ge.f32.partialorder %v2234_v59, 0.0  ;;  %v2298_v23 = vmul.f32 0.01, %v2234_v59  ;;  %v2187_v21 = vadd.f32 %v3196_v3, %v5141_v4  ;;  %v2181_v33 = vpop.f32.mrb[29].mxu0 }
 0x42d   : > { %2392 = vst [vmem:[%s4463_s7 + $0xc8] sm:$0xff] %v2360_v17  ;;  %vm2265_vm11 = vcmp.ge.f32.partialorder %v2233_v18, 0.0  ;;  %v2297_v55 = vmul.f32 0.01, %v2233_v18  ;;  %v2182_v20 = vadd.f32 %v2181_v33, %v5142_v25 }
 0x42e   : > { %2391 = vst [vmem:[%s4463_s7 + $0xc0] sm:$0xff] %v2359_v42  ;;  %v2330_v32 = vsel %vm2266_vm10, %v2234_v59, %v2298_v23  ;;  %v2236_v26 = vadd.f32 %v4807_v50, %v2187_v21 }
 0x42f   : > { %v2362_v61 = vadd.f32 %v2330_v32, %v5143_v5  ;;  %v2329_v56 = vsel %vm2265_vm11, %v2233_v18, %v2297_v55  ;;  %v2235_v40 = vadd.f32 %v4807_v50, %v2182_v20  ;;  %v3199_v6 = vpop.f32.mrb[30].mxu0 }
 0x430   : > { %v2361_v35 = vadd.f32 %v2329_v56, %v5144_v15  ;;  %vm2268_vm12 = vcmp.ge.f32.partialorder %v2236_v26, 0.0  ;;  %v2300_v62 = vmul.f32 0.01, %v2236_v26  ;;  %v2197_v27 = vadd.f32 %v3199_v6, %v5145_v49  ;;  %v2191_v34 = vpop.f32.mrb[31].mxu0 }
 0x431   : > { %2394 = vst [vmem:[%s4463_s7 + $0xd8] sm:$0xff] %v2362_v61  ;;  %vm2267_vm13 = vcmp.ge.f32.partialorder %v2235_v40, 0.0  ;;  %v2299_v48 = vmul.f32 0.01, %v2235_v40  ;;  %v2192_v47 = vadd.f32 %v2191_v34, %v5146_v7 }
 0x432   : > { %2393 = vst [vmem:[%s4463_s7 + $0xd0] sm:$0xff] %v2361_v35  ;;  %v2332_v12 = vsel %vm2268_vm12, %v2236_v26, %v2300_v62  ;;  %v2238_v24 = vadd.f32 %v4807_v50, %v2197_v27 }
 0x433   : > { %v2364_v51 = vadd.f32 %v2332_v12, %v5147_v8  ;;  %v2331_v37 = vsel %vm2267_vm13, %v2235_v40, %v2299_v48  ;;  %v2237_v63 = vadd.f32 %v4807_v50, %v2192_v47 }
 0x434   : > { %v2363_v45 = vadd.f32 %v2331_v37, %v5148_v57  ;;  %vm2270_vm14 = vcmp.ge.f32.partialorder %v2238_v24, 0.0  ;;  %v2302_v36 = vmul.f32 0.01, %v2238_v24 }
 0x435   : > { %2396 = vst [vmem:[%s4463_s7 + $0xe8] sm:$0xff] %v2364_v51  ;;  %vm2269_vm15 = vcmp.ge.f32.partialorder %v2237_v63, 0.0  ;;  %v2301_v52 = vmul.f32 0.01, %v2237_v63 }
 0x436   : > { %2395 = vst [vmem:[%s4463_s7 + $0xe0] sm:$0xff] %v2363_v45  ;;  %v2334_v9 = vsel %vm2270_vm14, %v2238_v24, %v2302_v36 }
 0x437   : > { %v2366_v44 = vadd.f32 %v2334_v9, %v5149_v0  ;;  %v2333_v29 = vsel %vm2269_vm15, %v2237_v63, %v2301_v52 }
 0x438   : > { %v2365_v58 = vadd.f32 %v2333_v29, %v5150_v10 }
 0x439   : > { %2398 = vst [vmem:[%s4463_s7 + $0xf8] sm:$0xff] %v2366_v44 }
 0x43a   : > { %2397 = vst [vmem:[%s4463_s7 + $0xf0] sm:$0xff] %v2365_v58 }
 0x43b PF: > { %s5151_s17 = sld [smem:[#allocation24_spill]]  ;;  %s5152_s16 = sld [smem:[#allocation51_spill]] }
 0x43c   : > { %s2413_s11 = sshll.u32 %s4463_s7, 4  ;;  %s4942_s30 = scalar_lea.sflag [#allocation5], %s389_s21  ;;  %s4938_s11 = int_to_ptr.vmem [resolvable:$true] %s2413_s11 }
 0x43d   : > { %s3808_s2 = scalar_lea.vmem %s4938_s11, 4096  ;;  %p5153_p0 = scmp.ne.s32.totalorder %s5099_s29, 0 }
 0x43e   : > { %p3809_p2 = scmp.ne.s32.totalorder %s4938_s11, %s3808_s2  ;;  %s3985_s23 = smov [#allocation14]  }
 0x43f   : > { %s3812_s6 = sshll.u32 %s3985_s23, 4  ;;  %s3813_s6 = int_to_ptr.vmem [resolvable:$false] %s3812_s6 }
 0x440   : > { %p3810_p5 = pnand %p3809_p2, %p5153_p0  ;;  %s3814_s22 = scalar_lea.vmem %s3813_s6, 8192 }
 0x441   : > { %s2687_s18 = sshll.u32 %s5151_s17, 12  ;;  %p3815_p13 = scmp.lt.s32.totalorder %s4938_s11, %s3813_s6 }
 0x442   : > { %s4935_s0 = scalar_lea.hbm %s5152_s16, %s2687_s18  ;;  %p3811_p9 = pneg %p3810_p5 }
 0x443   : > { %p3816_p12 = scmp.lt.s32.totalorder %s3814_s22, %s3808_s2 }
 0x445   : > { %p3817_p1 = por %p3816_p12, %p3815_p13 }
 0x447   : > { %p3818_p10 = pnand %p3817_p1, %p3811_p9 }
 0x449   : > { %3821 = shalt.err (!%p3818_p10)
}
 0x44a   : > { %s3822_s21 = scalar_lea.hbm %s4935_s0, 4096  ;;  %s3826_s15 = scalar_lea.hbm %s5152_s16, 16384 }
 0x44b   : > { %p3823_p6 = scmp.ne.s32.totalorder %s4935_s0, %s3822_s21  ;;  %p3827_p7 = scmp.lt.u32.totalorder %s4935_s0, %s5152_s16 }
 0x44c   : > { %p3828_p8 = scmp.lt.u32.totalorder %s3826_s15, %s3822_s21  ;;  %p3830_p2 = scmp.lt.u32.totalorder %s3822_s21, %s4935_s0 }
 0x44d   : > { %p3824_p11 = pnand %p3823_p6, %p5153_p0 }
 0x44e   : > { %p3829_p4 = por %p3828_p8, %p3827_p7 }
 0x44f   : > { %p3825_p3 = pneg %p3824_p11 }
 0x450   : > { %p3831_p5 = por %p3830_p2, %p3829_p4 }
 0x452   : > { %p3832_p9 = pnand %p3831_p5, %p3825_p3 }
 0x454   : > { %3835 = shalt.err (!%p3832_p9)
}
 0x455   : > { %s3986_s10 = smov 128   ;;  %s3987_s1 = smov 8  }
 0x456   : > { %3378 = dma.vmem_to_hbm [thread:$0]  (%p5153_p0), %s4938_s11, 4096, %s4935_s0, %s4942_s30, %s3986_s10, %s3986_s10, %s3987_s1  }
 0x457 PF: > { %p3411_p13 = scmp.ge.s32.totalorder %s3970_s14, 2  ;;  %s2428_s2 = sand.u32 1, %s3918_s24  }
 0x458   : > { %p5154_p12 = scmp.ne.s32.totalorder %s5102_s28, 0  ;;  %s2429_s23 = scalar_lea.sflag [#allocation5], %s2428_s2 }
 0x45a   : > { %p3401_p1 = pnand %p3411_p13, %p5154_p12 }
 0x45c   : > { %3913 = dma.done.wait (!%p3401_p1), %s2429_s23, 4096  }
 0x45d   : > { %3915 = vsyncadd (!%p3401_p1), %s2429_s23, 4294963200  ;;  %s28_s14 = sadd.s32 1, %s3970_s14   ;;  %s5156_s29 = sld [smem:[#allocation21_spill]] }
 0x45e   : > { %p4971_p10 = scmp.ge.s32.totalorder %s28_s14, 10   ;;  %s5157_s28 = sld [smem:[#allocation22_spill]] }
 0x45f   : > { %s5158_s0 = sld [smem:[#allocation28_spill]]  ;;  %s5159_s22 = sld [smem:[#allocation26_spill]] }
 0x460   : > { %s5160_s21 = sld [smem:[#allocation27_spill]]  ;;  %s5161_s24 = smov %s3922_s25 }
 0x461   : > { %s5162_s25 = smov %s3926_s26  ;;  %s5163_s26 = smov %s4351_s27 }
 0x462   : > { %s5166_s30 = smov %s3946_s8  ;;  %s5167_s8 = smov %s3950_s9 }
 0x463   : > { %s5164_s27 = smov %s5156_s29  ;;  %s5168_s9 = smov %s4282_s19 }
 0x464   : > { %s5169_s10 = smov %s3962_s12  ;;  %s5170_s11 = smov %s3966_s13 }
 0x465   : > { %s5165_s29 = smov %s5158_s0  ;;  %s5171_s12 = smov %s5159_s22 }
 0x466   : > { %s5172_s13 = smov %s5160_s21  ;;  %27 = sbr.rel (!%p4971_p10) target bundleno = 21 (0x15), region = 140 }
 0x46d   :  { %2434 = vsyncpa [#allocation4], 1 }
 0x46e   :  { %2436 = vsyncpa [#allocation4 + $0x1], 1 }
 0x46f   :  { %2437 = vsyncpa [#allocation7], 1 }
 0x470   :  { %2439 = vsyncpa [#allocation7 + $0x1], 1 }
 0x471   :  { %2440 = vsyncpa [#allocation10], 1 }
 0x472   :  { %2441 = vsyncpa [#allocation13], 1 }
 0x473   :  { %2442 = vsyncpa [#allocation5], 1 }
 0x474   :  { %2444 = vsyncpa [#allocation5 + $0x1], 1 }

</bundles_post_ra>
